<compile_context>
chip_gen: v7x
topology: tpu7x:2x2x1
jax: 0.10.0
libtpu: 0.0.40
codegen_flags: <defaults>
</compile_context>

<pallas_src>
import functools
import math

import jax
import jax.numpy as jnp
from jax.experimental import pallas as pl
from jax.experimental.pallas import tpu as pltpu

# ----------------------------- dimensions ------------------------------------
T, B = 4, 2
C, H, W = 3, 16, 16
TTY_ROWS, TTY_COLS = 24, 80

TOP_DIM, BOT_DIM, SCR_DIM = 64, 64, 128
H_DIM = TOP_DIM + BOT_DIM + SCR_DIM          # 256  (h_dim in the module)
LSTM_HID = 128                               # LSTM core hidden size (small demo)
D_MODEL = H_DIM + LSTM_HID                   # 384  (hidden_dim = h_dim + lstm hidden)
N_HEADS = 3                                  # head_dim = 128 (lane aligned)
HEAD_DIM = D_MODEL // N_HEADS
D_FF = 512
N_TRN_LAYERS = 2
N_STRAT = 20
POLICY_HID = 256
N_ACTIONS = 16
MAX_LEN = 64
STRAT_BLK = 5                                # strategies per policy-kernel grid step


def _full_spec(shape):
    nd = len(shape)
    return pl.BlockSpec(shape, lambda *_: (0,) * nd)


def _elu(y):
    # safe ELU (exp only on the non-positive branch values)
    return jnp.where(y > 0, y, jnp.exp(jnp.minimum(y, 0.0)) - 1.0)


# -------------------- fused encoders + LSTM input projection ------------------
def _encoder_kernel(top_ref, bot_ref, scr_ref,
                    twl_ref, tbl_ref, bwl_ref, bbl_ref, swl_ref, sbl_ref,
                    twt_ref, tbt_ref, bwt_ref, bbt_ref, swt_ref, sbt_ref,
                    wih_ref, bih_ref,
                    st_trn_ref, gx_ref):
    top = top_ref[...]
    bot = bot_ref[...]
    scr = scr_ref[...]

    def dense(x, w_ref, b_ref):
        return jnp.dot(x, w_ref[...],
                       preferred_element_type=jnp.float32) + b_ref[...]

    # LSTM-path encoders -> fused LSTM input projection (hoisted out of the
    # sequential time loop: gates_x = st_lstm @ Wih^T + bih for all T at once).
    st_lstm = jnp.concatenate(
        [_elu(dense(top, twl_ref, tbl_ref)),
         _elu(dense(bot, bwl_ref, bbl_ref)),
         _elu(dense(scr, swl_ref, sbl_ref))], axis=1)
    gx_ref[...] = (jnp.dot(st_lstm, wih_ref[...],
                           preferred_element_type=jnp.float32) + bih_ref[...])

    # transformer-path encoders
    st_trn_ref[...] = jnp.concatenate(
        [_elu(dense(top, twt_ref, tbt_ref)),
         _elu(dense(bot, bwt_ref, bbt_ref)),
         _elu(dense(scr, swt_ref, sbt_ref))], axis=1)


def pallas_encoders(topline, bottom, scr, params):
    n = topline.shape[0]
    el, et, lst = params['enc_lstm'], params['enc_trn'], params['lstm']
    args = (topline, bottom, scr,
            el['top_w'], el['top_b'], el['bot_w'], el['bot_b'],
            el['scr_w'], el['scr_b'],
            et['top_w'], et['top_b'], et['bot_w'], et['bot_b'],
            et['scr_w'], et['scr_b'],
            lst['wih'], lst['bih'])
    return pl.pallas_call(
        _encoder_kernel,
        out_shape=(jax.ShapeDtypeStruct((n, H_DIM), jnp.float32),
                   jax.ShapeDtypeStruct((n, 4 * LSTM_HID), jnp.float32)),
        grid=(1,),
        in_specs=[_full_spec(a.shape) for a in args],
        out_specs=(_full_spec((n, H_DIM)), _full_spec((n, 4 * LSTM_HID))),
    )(*args)


# ------------------------------ LSTM kernel ----------------------------------
def _lstm_kernel(gx_ref, nd_ref, h0_ref, c0_ref, whh_ref, bhh_ref,
                 out_ref, hN_ref, cN_ref, *, t_steps, hid):
    whh = whh_ref[...]                        # (HID, 4*HID), pre-transposed
    bhh = bhh_ref[...]                        # (1, 4*HID)
    h = h0_ref[...]
    c = c0_ref[...]
    # Fully unrolled recurrence (T small & static): only h @ Whh is on the
    # serial critical path; the input projection was hoisted into the encoder.
    for t in range(t_steps):
        nd = nd_ref[t]                        # (B, HID) lane-dense notdone mask
        h = h * nd
        c = c * nd
        gates = (gx_ref[t]
                 + jnp.dot(h, whh, preferred_element_type=jnp.float32) + bhh)
        i = jax.nn.sigmoid(gates[:, 0:hid])
        f = jax.nn.sigmoid(gates[:, hid:2 * hid])
        g = jnp.tanh(gates[:, 2 * hid:3 * hid])
        o = jax.nn.sigmoid(gates[:, 3 * hid:4 * hid])
        c = f * c + i * g
        h = o * jnp.tanh(c)
        out_ref[t] = h
    hN_ref[...] = h                           # final state written once
    cN_ref[...] = c


def pallas_lstm(gates_x, nd, h0, c0, whh, bhh):
    t, b, g4 = gates_x.shape
    hd = h0.shape[-1]
    kernel = functools.partial(_lstm_kernel, t_steps=t, hid=hd)
    return pl.pallas_call(
        kernel,
        out_shape=(jax.ShapeDtypeStruct((t, b, hd), jnp.float32),
                   jax.ShapeDtypeStruct((b, hd), jnp.float32),
                   jax.ShapeDtypeStruct((b, hd), jnp.float32)),
        grid=(1,),
        in_specs=[_full_spec((t, b, g4)), _full_spec((t, b, hd)),
                  _full_spec((b, hd)), _full_spec((b, hd)),
                  _full_spec((hd, g4)), _full_spec((1, g4))],
        out_specs=(_full_spec((t, b, hd)), _full_spec((b, hd)),
                   _full_spec((b, hd))),
    )(gates_x, nd, h0, c0, whh, bhh)


# ------------------- fused transformer encoder stack --------------------------
def _transformer_stack_kernel(x_ref, mask_ref, ln1g_ref, ln1b_ref, wqkv_ref,
                              bqkv_ref, wo_ref, bo_ref, ln2g_ref, ln2b_ref,
                              w1_ref, b1_ref, w2_ref, b2_ref, o_ref, x_sc,
                              *, n_heads):
    layer = pl.program_id(0)

    @pl.when(layer == 0)
    def _():
        x_sc[...] = x_ref[...]

    x = x_sc[...]                             # (B, T, D) f32, VMEM-resident
    b, t, d = x.shape
    hd = d // n_heads

    def ln(v, g_ref, beta_ref):
        mu = jnp.mean(v, axis=-1, keepdims=True)
        var = jnp.mean(jnp.square(v - mu), axis=-1, keepdims=True)
        return (v - mu) * jax.lax.rsqrt(var + 1e-5) * g_ref[0] + beta_ref[0]

    # --- self-attention (pre-norm, norm_first=True) ---
    xn = ln(x, ln1g_ref, ln1b_ref)
    qkv = (jnp.einsum('btd,de->bte', xn.astype(jnp.bfloat16), wqkv_ref[0],
                      preferred_element_type=jnp.float32) + bqkv_ref[0])
    q, k, v = qkv[..., :d], qkv[..., d:2 * d], qkv[..., 2 * d:]

    # head-major batched attention: pack heads into the batch dim (H*B, T, hd)
    qh = jnp.concatenate([q[..., h * hd:(h + 1) * hd] for h in range(n_heads)],
                         axis=0)
    kh = jnp.concatenate([k[..., h * hd:(h + 1) * hd] for h in range(n_heads)],
                         axis=0)
    vh = jnp.concatenate([v[..., h * hd:(h + 1) * hd] for h in range(n_heads)],
                         axis=0)

    scale = 1.0 / jnp.sqrt(jnp.float32(hd))
    s = (jnp.einsum('ntd,nsd->nts', qh, kh,
                    preferred_element_type=jnp.float32) * scale + mask_ref[...])
    p = jax.nn.softmax(s, axis=-1)
    ctx_h = jnp.einsum('nts,nsd->ntd', p, vh, preferred_element_type=jnp.float32)
    ctx = jnp.concatenate([ctx_h[h * b:(h + 1) * b] for h in range(n_heads)],
                          axis=-1)                      # (B, T, D)

    attn = (jnp.einsum('btd,de->bte', ctx.astype(jnp.bfloat16), wo_ref[0],
                       preferred_element_type=jnp.float32) + bo_ref[0])
    x = x + attn

    # --- feed-forward (pre-norm, gelu) ---
    # TODO(synk): tanh-approx gelu (PyTorch default is exact erf); dropout omitted.
    xn2 = ln(x, ln2g_ref, ln2b_ref)
    h1 = (jnp.einsum('btd,df->btf', xn2.astype(jnp.bfloat16), w1_ref[0],
                     preferred_element_type=jnp.float32) + b1_ref[0])
    h1 = jax.nn.gelu(h1, approximate=True)
    ffn = (jnp.einsum('btf,fd->btd', h1.astype(jnp.bfloat16), w2_ref[0],
                      preferred_element_type=jnp.float32) + b2_ref[0])
    x = x + ffn

    x_sc[...] = x                             # carry to next layer (VMEM resident)

    @pl.when(layer == pl.num_programs(0) - 1)
    def _():
        o_ref[...] = x


def pallas_transformer_stack(x_btd, mask, tp, n_heads):
    b, t, d = x_btd.shape
    n_layers = tp['wqkv'].shape[0]

    def shared(shape):
        nd = len(shape)
        return pl.BlockSpec(shape, lambda l: (0,) * nd)

    def stacked(arr):
        shp = arr.shape
        return pl.BlockSpec((1,) + shp[1:],
                            lambda l: (l,) + (0,) * (len(shp) - 1))

    order = ('ln1_g', 'ln1_b', 'wqkv', 'bqkv', 'wo', 'bo',
             'ln2_g', 'ln2_b', 'w1', 'b1', 'w2', 'b2')
    stacked_args = [tp[k] for k in order]

    kernel = functools.partial(_transformer_stack_kernel, n_heads=n_heads)
    return pl.pallas_call(
        kernel,
        out_shape=jax.ShapeDtypeStruct((b, t, d), jnp.float32),
        grid=(n_layers,),
        in_specs=[shared((b, t, d)), shared((t, t))]
                 + [stacked(a) for a in stacked_args],
        out_specs=shared((b, t, d)),
        scratch_shapes=[pltpu.VMEM((b, t, d), jnp.float32)],
        compiler_params=pltpu.CompilerParams(
            dimension_semantics=("arbitrary",)),
    )(x_btd, mask, *stacked_args)


# ------------------------- fused strategy+baseline head -----------------------
def _linear_kernel(x_ref, w_ref, b_ref, o_ref):
    o_ref[...] = (jnp.dot(x_ref[...], w_ref[...],
                          preferred_element_type=jnp.float32) + b_ref[...])


def pallas_linear(x, w, b):
    n, din = x.shape
    dout = w.shape[1]
    return pl.pallas_call(
        _linear_kernel,
        out_shape=jax.ShapeDtypeStruct((n, dout), jnp.float32),
        grid=(1,),
        in_specs=[_full_spec((n, din)), _full_spec((din, dout)),
                  _full_spec((1, dout))],
        out_specs=_full_spec((n, dout)),
    )(x, w, b)


# ---------------------- strategy-wise policy heads ----------------------------
def _policy_kernel(x_ref, w1_ref, b1_ref, w2_ref, b2_ref, o_ref, *, strat_blk):
    x = x_ref[...].astype(jnp.bfloat16)                  # (N, D)
    for j in range(strat_blk):
        h = (jnp.dot(x, w1_ref[j], preferred_element_type=jnp.float32)
             + b1_ref[j])
        h = _elu(h)
        o_ref[j] = (jnp.dot(h.astype(jnp.bfloat16), w2_ref[j],
                            preferred_element_type=jnp.float32) + b2_ref[j])


def pallas_policies(x, w1, b1, w2, b2):
    s, d, p_hid = w1.shape
    a = w2.shape[-1]
    n = x.shape[0]
    kernel = functools.partial(_policy_kernel, strat_blk=STRAT_BLK)
    return pl.pallas_call(
        kernel,
        out_shape=jax.ShapeDtypeStruct((s, n, a), jnp.float32),
        grid=(s // STRAT_BLK,),
        in_specs=[pl.BlockSpec((n, d), lambda i: (0, 0)),
                  pl.BlockSpec((STRAT_BLK, d, p_hid), lambda i: (i, 0, 0)),
                  pl.BlockSpec((STRAT_BLK, 1, p_hid), lambda i: (i, 0, 0)),
                  pl.BlockSpec((STRAT_BLK, p_hid, a), lambda i: (i, 0, 0)),
                  pl.BlockSpec((STRAT_BLK, 1, a), lambda i: (i, 0, 0))],
        out_specs=pl.BlockSpec((STRAT_BLK, n, a), lambda i: (i, 0, 0)),
        compiler_params=pltpu.CompilerParams(
            dimension_semantics=("parallel",)),
    )(x, w1, b1, w2, b2)


# ------------------------------ parameters ------------------------------------
def _dense_t(key, din, dout, scale=0.05, dtype=jnp.float32):
    # weight stored pre-transposed as (Din, Dout) so kernels compute x @ W
    kw, kb = jax.random.split(key)
    w = (scale * jax.random.normal(kw, (din, dout), jnp.float32)).astype(dtype)
    b = scale * jax.random.normal(kb, (1, dout), jnp.float32)
    return w, b


def init_params(key):
    keys = iter(jax.random.split(key, 64))
    p = {}
    for name in ('enc_lstm', 'enc_trn'):
        tw, tb = _dense_t(next(keys), TTY_COLS, TOP_DIM)
        bw, bb = _dense_t(next(keys), 2 * TTY_COLS, BOT_DIM)
        sw, sb = _dense_t(next(keys), C * H * W, SCR_DIM)
        p[name] = dict(top_w=tw, top_b=tb, bot_w=bw, bot_b=bb,
                       scr_w=sw, scr_b=sb)

    wih, bih = _dense_t(next(keys), H_DIM, 4 * LSTM_HID)
    whh, bhh = _dense_t(next(keys), LSTM_HID, 4 * LSTM_HID)
    p['lstm'] = dict(wih=wih, whh=whh, bih=bih, bhh=bhh)

    # transformer layer params stacked along a leading layer axis (weights bf16)
    stacks = {k: [] for k in ('wqkv', 'bqkv', 'wo', 'bo', 'w1', 'b1', 'w2', 'b2')}
    for _ in range(N_TRN_LAYERS):
        wqkv, bqkv = _dense_t(next(keys), D_MODEL, 3 * D_MODEL, dtype=jnp.bfloat16)
        wo, bo = _dense_t(next(keys), D_MODEL, D_MODEL, dtype=jnp.bfloat16)
        w1, b1 = _dense_t(next(keys), D_MODEL, D_FF, dtype=jnp.bfloat16)
        w2, b2 = _dense_t(next(keys), D_FF, D_MODEL, dtype=jnp.bfloat16)
        for k, v in (('wqkv', wqkv), ('bqkv', bqkv), ('wo', wo), ('bo', bo),
                     ('w1', w1), ('b1', b1), ('w2', w2), ('b2', b2)):
            stacks[k].append(v)
    trn = {k: jnp.stack(v) for k, v in stacks.items()}
    trn['ln1_g'] = jnp.ones((N_TRN_LAYERS, 1, D_MODEL), jnp.float32)
    trn['ln1_b'] = jnp.zeros((N_TRN_LAYERS, 1, D_MODEL), jnp.float32)
    trn['ln2_g'] = jnp.ones((N_TRN_LAYERS, 1, D_MODEL), jnp.float32)
    trn['ln2_b'] = jnp.zeros((N_TRN_LAYERS, 1, D_MODEL), jnp.float32)
    p['trn'] = trn

    # fused strategy (N_STRAT) + baseline (1) head
    hw, hb = _dense_t(next(keys), D_MODEL, N_STRAT + 1)
    p['head_w'], p['head_b'] = hw, hb

    p['pol_w1'] = (0.05 * jax.random.normal(
        next(keys), (N_STRAT, D_MODEL, POLICY_HID))).astype(jnp.bfloat16)
    p['pol_b1'] = 0.05 * jax.random.normal(next(keys), (N_STRAT, 1, POLICY_HID))
    p['pol_w2'] = (0.05 * jax.random.normal(
        next(keys), (N_STRAT, POLICY_HID, N_ACTIONS))).astype(jnp.bfloat16)
    p['pol_b2'] = 0.05 * jax.random.normal(next(keys), (N_STRAT, 1, N_ACTIONS))

    # sinusoidal positional encoding table (max_len, d_model)
    pos = jnp.arange(MAX_LEN, dtype=jnp.float32)[:, None]
    div = jnp.exp(jnp.arange(0, D_MODEL, 2, dtype=jnp.float32)
                  * (-math.log(10000.0) / D_MODEL))
    pe = jnp.zeros((MAX_LEN, D_MODEL), jnp.float32)
    pe = pe.at[:, 0::2].set(jnp.sin(pos * div))
    pe = pe.at[:, 1::2].set(jnp.cos(pos * div))
    p['pe'] = pe
    return p


def initial_state(batch_size=1, unroll_len=T):
    return (jnp.zeros((1, batch_size, unroll_len, unroll_len), jnp.float32),
            jax.random.uniform(jax.random.PRNGKey(42),
                               (unroll_len, batch_size, D_MODEL)),
            jnp.zeros((1, batch_size, LSTM_HID), jnp.float32),
            jnp.zeros((1, batch_size, LSTM_HID), jnp.float32))


# ------------------------------- forward --------------------------------------
def forward(params, inputs, core_state, rng):
    screen = inputs['screen_image']                 # (T, B, C, H, W)
    tty = inputs['tty_chars']                       # (T, B, 24, 80)
    done = inputs['done']                           # (T, B) bool
    t, b = screen.shape[0], screen.shape[1]
    n = t * b

    topline = tty[..., 0, :].astype(jnp.float32).reshape(n, -1)
    bottom = tty[..., -2:, :].astype(jnp.float32).reshape(n, -1)
    scr = screen.astype(jnp.float32).reshape(n, -1)

    # fused encoders: transformer-path features + hoisted LSTM input projection
    st_trn, gates_x = pallas_encoders(topline, bottom, scr, params)

    c0, c1, c2, c3 = core_state
    notdone = (~done).astype(jnp.float32)
    nd = jnp.broadcast_to(notdone[..., None], (t, b, LSTM_HID))   # lane-dense mask

    lp = params['lstm']
    lstm_out, h_n, c_n = pallas_lstm(gates_x.reshape(t, b, -1), nd,
                                     c2[0], c3[0], lp['whh'], lp['bhh'])
    lstm_flat = lstm_out.reshape(n, -1)

    st = jnp.concatenate([st_trn, lstm_flat], axis=1)             # (N, D_MODEL)
    x = st.reshape(t, b, D_MODEL) + params['pe'][:t][:, None, :]  # positional enc

    # causal mask: 0 on/below diagonal, -inf above (generate_square_subsequent_mask)
    mask = jnp.where(jnp.tril(jnp.ones((t, t), jnp.bool_)),
                     jnp.float32(0.0), jnp.float32(-jnp.inf))

    xb = jnp.transpose(x, (1, 0, 2))                              # (B, T, D)
    xb = pallas_transformer_stack(xb, mask, params['trn'], N_HEADS)
    trn_out = jnp.transpose(xb, (1, 0, 2)).reshape(n, D_MODEL)

    head_out = pallas_linear(trn_out, params['head_w'], params['head_b'])
    strategy_logits = head_out[:, :N_STRAT]
    baseline = head_out[:, N_STRAT:N_STRAT + 1]

    all_policy_logits = pallas_policies(trn_out, params['pol_w1'],
                                        params['pol_b1'], params['pol_w2'],
                                        params['pol_b2'])         # (S, N, A)

    # gumbel-softmax (hard=True) forward value = one-hot(argmax(logits + gumbel))
    # TODO(synk): straight-through gradient not implemented (forward-only path).
    k1, k2 = jax.random.split(rng)
    u = jax.random.uniform(k1, strategy_logits.shape,
                           minval=1e-6, maxval=1.0 - 1e-6)
    gumbel = -jnp.log(-jnp.log(u))
    strat_choice = jnp.argmax(strategy_logits + gumbel, axis=-1)
    strategy_sample = jax.nn.one_hot(strat_choice, N_STRAT, dtype=jnp.float32)

    out_policy_logits = jnp.einsum('sna,ns->na', all_policy_logits,
                                   strategy_sample)               # (N, A)
    action = jax.random.categorical(k2, out_policy_logits, axis=-1)

    out_policy_logits = out_policy_logits.reshape(t, b, -1)
    baseline = baseline.reshape(t, b)
    action = action.reshape(t, b)
    strategy_logits = strategy_logits.reshape(t, b, -1)
    strategy = jnp.argmax(strategy_logits, axis=-1)
    version = jnp.zeros_like(action)

    output = dict(policy_logits=out_policy_logits, baseline=baseline,
                  action=action, strategy=strategy, version=version,
                  strategy_logits=strategy_logits)
    new_core_state = (c0, c1, h_n[None], c_n[None])
    return output, new_core_state


# --------------------------------- main ----------------------------------------
if __name__ == "__main__":
    root = jax.random.PRNGKey(0)
    k_params, k_tty, k_scr, k_fwd = jax.random.split(root, 4)

    params = init_params(k_params)

    tty_chars = jax.random.randint(k_tty, (T, B, TTY_ROWS, TTY_COLS), 32, 128,
                                   dtype=jnp.int32).astype(jnp.uint8)
    screen_image = jax.random.randint(k_scr, (T, B, C, H, W), 0, 256,
                                      dtype=jnp.int32).astype(jnp.uint8)
    done = jnp.zeros((T, B), jnp.bool_).at[2, 1].set(True)

    inputs = dict(screen_image=screen_image, tty_chars=tty_chars, done=done)
    core_state = initial_state(batch_size=B, unroll_len=T)

    output, new_core_state = forward(params, inputs, core_state, k_fwd)
    jax.block_until_ready(output)
    jax.block_until_ready(new_core_state)

    assert output['policy_logits'].shape == (T, B, N_ACTIONS)
    assert output['baseline'].shape == (T, B)
    assert output['action'].shape == (T, B)
    assert output['strategy_logits'].shape == (T, B, N_STRAT)
    assert new_core_state[2].shape == (1, B, LSTM_HID)

    print("KERNEL_OK")
</pallas_src>

<mosaic_0001>
module attributes {stable_mosaic.version = 11 : i64} {
  func.func @_encoder_kernel(%arg0: i32, %arg1: memref<8x80xf32, #tpu.memory_space<vmem>>, %arg2: memref<8x160xf32, #tpu.memory_space<vmem>>, %arg3: memref<8x768xf32, #tpu.memory_space<vmem>>, %arg4: memref<80x64xf32, #tpu.memory_space<vmem>>, %arg5: memref<1x64xf32, #tpu.memory_space<vmem>>, %arg6: memref<160x64xf32, #tpu.memory_space<vmem>>, %arg7: memref<1x64xf32, #tpu.memory_space<vmem>>, %arg8: memref<768x128xf32, #tpu.memory_space<vmem>>, %arg9: memref<1x128xf32, #tpu.memory_space<vmem>>, %arg10: memref<80x64xf32, #tpu.memory_space<vmem>>, %arg11: memref<1x64xf32, #tpu.memory_space<vmem>>, %arg12: memref<160x64xf32, #tpu.memory_space<vmem>>, %arg13: memref<1x64xf32, #tpu.memory_space<vmem>>, %arg14: memref<768x128xf32, #tpu.memory_space<vmem>>, %arg15: memref<1x128xf32, #tpu.memory_space<vmem>>, %arg16: memref<256x512xf32, #tpu.memory_space<vmem>>, %arg17: memref<1x512xf32, #tpu.memory_space<vmem>>, %arg18: memref<8x256xf32, #tpu.memory_space<vmem>>, %arg19: memref<8x512xf32, #tpu.memory_space<vmem>>) attributes {dimension_semantics = [#tpu.dimension_semantics<arbitrary>], iteration_bounds = array<i64: 1>, scalar_prefetch = 0 : i64, scratch_operands = 0 : i64, tpu.core_type = #tpu.core_type<tc>, window_params = [{pipeline_mode = #tpu.pipeline_mode<synchronous>, transform_indices = @transform_0, window_bounds = array<i64: 8, 80>}, {pipeline_mode = #tpu.pipeline_mode<synchronous>, transform_indices = @transform_1, window_bounds = array<i64: 8, 160>}, {pipeline_mode = #tpu.pipeline_mode<synchronous>, transform_indices = @transform_2, window_bounds = array<i64: 8, 768>}, {pipeline_mode = #tpu.pipeline_mode<synchronous>, transform_indices = @transform_3, window_bounds = array<i64: 80, 64>}, {pipeline_mode = #tpu.pipeline_mode<synchronous>, transform_indices = @transform_4, window_bounds = array<i64: 1, 64>}, {pipeline_mode = #tpu.pipeline_mode<synchronous>, transform_indices = @transform_5, window_bounds = array<i64: 160, 64>}, {pipeline_mode = #tpu.pipeline_mode<synchronous>, transform_indices = @transform_6, window_bounds = array<i64: 1, 64>}, {pipeline_mode = #tpu.pipeline_mode<synchronous>, transform_indices = @transform_7, window_bounds = array<i64: 768, 128>}, {pipeline_mode = #tpu.pipeline_mode<synchronous>, transform_indices = @transform_8, window_bounds = array<i64: 1, 128>}, {pipeline_mode = #tpu.pipeline_mode<synchronous>, transform_indices = @transform_9, window_bounds = array<i64: 80, 64>}, {pipeline_mode = #tpu.pipeline_mode<synchronous>, transform_indices = @transform_10, window_bounds = array<i64: 1, 64>}, {pipeline_mode = #tpu.pipeline_mode<synchronous>, transform_indices = @transform_11, window_bounds = array<i64: 160, 64>}, {pipeline_mode = #tpu.pipeline_mode<synchronous>, transform_indices = @transform_12, window_bounds = array<i64: 1, 64>}, {pipeline_mode = #tpu.pipeline_mode<synchronous>, transform_indices = @transform_13, window_bounds = array<i64: 768, 128>}, {pipeline_mode = #tpu.pipeline_mode<synchronous>, transform_indices = @transform_14, window_bounds = array<i64: 1, 128>}, {pipeline_mode = #tpu.pipeline_mode<synchronous>, transform_indices = @transform_15, window_bounds = array<i64: 256, 512>}, {pipeline_mode = #tpu.pipeline_mode<synchronous>, transform_indices = @transform_16, window_bounds = array<i64: 1, 512>}, {pipeline_mode = #tpu.pipeline_mode<synchronous>, transform_indices = @transform_17, window_bounds = array<i64: 8, 256>}, {pipeline_mode = #tpu.pipeline_mode<synchronous>, transform_indices = @transform_18, window_bounds = array<i64: 8, 512>}]} {
    %c0 = arith.constant 0 : index
    %c0_0 = arith.constant 0 : index
    %0 = vector.load %arg1[%c0, %c0_0] : memref<8x80xf32, #tpu.memory_space<vmem>>, vector<8x80xf32>
    %c0_1 = arith.constant 0 : index
    %c0_2 = arith.constant 0 : index
    %1 = vector.load %arg2[%c0_1, %c0_2] : memref<8x160xf32, #tpu.memory_space<vmem>>, vector<8x160xf32>
    %c0_3 = arith.constant 0 : index
    %c0_4 = arith.constant 0 : index
    %2 = vector.load %arg3[%c0_3, %c0_4] : memref<8x768xf32, #tpu.memory_space<vmem>>, vector<8x768xf32>
    %c0_5 = arith.constant 0 : index
    %c0_6 = arith.constant 0 : index
    %3 = vector.load %arg4[%c0_5, %c0_6] : memref<80x64xf32, #tpu.memory_space<vmem>>, vector<80x64xf32>
    %cst = arith.constant dense<0.000000e+00> : vector<8x64xf32>
    %4 = tpu.matmul %0, %3, %cst {dimension_numbers = #tpu.dot_dimension_numbers<[1], [0], [0], [1], [0, 0, 1, 1], [], []>} : vector<8x80xf32>, vector<80x64xf32>, vector<8x64xf32> -> vector<8x64xf32>
    %c0_7 = arith.constant 0 : index
    %c0_8 = arith.constant 0 : index
    %5 = vector.load %arg5[%c0_7, %c0_8] : memref<1x64xf32, #tpu.memory_space<vmem>>, vector<1x64xf32>
    %6 = vector.broadcast %5 : vector<1x64xf32> to vector<8x64xf32>
    %7 = arith.addf %4, %6 : vector<8x64xf32>
    %cst_9 = arith.constant 0.000000e+00 : f32
    %8 = vector.broadcast %cst_9 : f32 to vector<8x64xf32>
    %9 = arith.cmpf ogt, %7, %8 : vector<8x64xf32>
    %cst_10 = arith.constant 0.000000e+00 : f32
    %10 = vector.broadcast %cst_10 : f32 to vector<8x64xf32>
    %11 = arith.minimumf %7, %10 : vector<8x64xf32>
    %12 = math.exp %11 : vector<8x64xf32>
    %cst_11 = arith.constant 1.000000e+00 : f32
    %13 = vector.broadcast %cst_11 : f32 to vector<8x64xf32>
    %14 = arith.subf %12, %13 : vector<8x64xf32>
    %15 = arith.select %9, %7, %14 : vector<8x64xi1>, vector<8x64xf32>
    %c0_12 = arith.constant 0 : index
    %c0_13 = arith.constant 0 : index
    %16 = vector.load %arg6[%c0_12, %c0_13] : memref<160x64xf32, #tpu.memory_space<vmem>>, vector<160x64xf32>
    %cst_14 = arith.constant dense<0.000000e+00> : vector<8x64xf32>
    %17 = tpu.matmul %1, %16, %cst_14 {dimension_numbers = #tpu.dot_dimension_numbers<[1], [0], [0], [1], [0, 0, 1, 1], [], []>} : vector<8x160xf32>, vector<160x64xf32>, vector<8x64xf32> -> vector<8x64xf32>
    %c0_15 = arith.constant 0 : index
    %c0_16 = arith.constant 0 : index
    %18 = vector.load %arg7[%c0_15, %c0_16] : memref<1x64xf32, #tpu.memory_space<vmem>>, vector<1x64xf32>
    %19 = vector.broadcast %18 : vector<1x64xf32> to vector<8x64xf32>
    %20 = arith.addf %17, %19 : vector<8x64xf32>
    %cst_17 = arith.constant 0.000000e+00 : f32
    %21 = vector.broadcast %cst_17 : f32 to vector<8x64xf32>
    %22 = arith.cmpf ogt, %20, %21 : vector<8x64xf32>
    %cst_18 = arith.constant 0.000000e+00 : f32
    %23 = vector.broadcast %cst_18 : f32 to vector<8x64xf32>
    %24 = arith.minimumf %20, %23 : vector<8x64xf32>
    %25 = math.exp %24 : vector<8x64xf32>
    %cst_19 = arith.constant 1.000000e+00 : f32
    %26 = vector.broadcast %cst_19 : f32 to vector<8x64xf32>
    %27 = arith.subf %25, %26 : vector<8x64xf32>
    %28 = arith.select %22, %20, %27 : vector<8x64xi1>, vector<8x64xf32>
    %c0_20 = arith.constant 0 : index
    %c0_21 = arith.constant 0 : index
    %29 = vector.load %arg8[%c0_20, %c0_21] : memref<768x128xf32, #tpu.memory_space<vmem>>, vector<768x128xf32>
    %cst_22 = arith.constant dense<0.000000e+00> : vector<8x128xf32>
    %30 = tpu.matmul %2, %29, %cst_22 {dimension_numbers = #tpu.dot_dimension_numbers<[1], [0], [0], [1], [0, 0, 1, 1], [], []>} : vector<8x768xf32>, vector<768x128xf32>, vector<8x128xf32> -> vector<8x128xf32>
    %c0_23 = arith.constant 0 : index
    %c0_24 = arith.constant 0 : index
    %31 = vector.load %arg9[%c0_23, %c0_24] : memref<1x128xf32, #tpu.memory_space<vmem>>, vector<1x128xf32>
    %32 = vector.broadcast %31 : vector<1x128xf32> to vector<8x128xf32>
    %33 = arith.addf %30, %32 : vector<8x128xf32>
    %cst_25 = arith.constant 0.000000e+00 : f32
    %34 = vector.broadcast %cst_25 : f32 to vector<8x128xf32>
    %35 = arith.cmpf ogt, %33, %34 : vector<8x128xf32>
    %cst_26 = arith.constant 0.000000e+00 : f32
    %36 = vector.broadcast %cst_26 : f32 to vector<8x128xf32>
    %37 = arith.minimumf %33, %36 : vector<8x128xf32>
    %38 = math.exp %37 : vector<8x128xf32>
    %cst_27 = arith.constant 1.000000e+00 : f32
    %39 = vector.broadcast %cst_27 : f32 to vector<8x128xf32>
    %40 = arith.subf %38, %39 : vector<8x128xf32>
    %41 = arith.select %35, %33, %40 : vector<8x128xi1>, vector<8x128xf32>
    %42 = tpu.concatenate %15, %28, %41 in 1 : vector<8x64xf32>, vector<8x64xf32>, vector<8x128xf32> -> vector<8x256xf32>
    %c0_28 = arith.constant 0 : index
    %c0_29 = arith.constant 0 : index
    %43 = vector.load %arg16[%c0_28, %c0_29] : memref<256x512xf32, #tpu.memory_space<vmem>>, vector<256x512xf32>
    %cst_30 = arith.constant dense<0.000000e+00> : vector<8x512xf32>
    %44 = tpu.matmul %42, %43, %cst_30 {dimension_numbers = #tpu.dot_dimension_numbers<[1], [0], [0], [1], [0, 0, 1, 1], [], []>} : vector<8x256xf32>, vector<256x512xf32>, vector<8x512xf32> -> vector<8x512xf32>
    %c0_31 = arith.constant 0 : index
    %c0_32 = arith.constant 0 : index
    %45 = vector.load %arg17[%c0_31, %c0_32] : memref<1x512xf32, #tpu.memory_space<vmem>>, vector<1x512xf32>
    %46 = vector.broadcast %45 : vector<1x512xf32> to vector<8x512xf32>
    %47 = arith.addf %44, %46 : vector<8x512xf32>
    %c0_33 = arith.constant 0 : index
    %c0_34 = arith.constant 0 : index
    %48 = vector.load %arg19[%c0_33, %c0_34] : memref<8x512xf32, #tpu.memory_space<vmem>>, vector<8x512xf32>
    tpu.vector_store %arg19[%c0_33, %c0_34], %47 {strides = array<i32>} : memref<8x512xf32, #tpu.memory_space<vmem>>, vector<8x512xf32>,
    %c0_35 = arith.constant 0 : index
    %c0_36 = arith.constant 0 : index
    %49 = vector.load %arg10[%c0_35, %c0_36] : memref<80x64xf32, #tpu.memory_space<vmem>>, vector<80x64xf32>
    %cst_37 = arith.constant dense<0.000000e+00> : vector<8x64xf32>
    %50 = tpu.matmul %0, %49, %cst_37 {dimension_numbers = #tpu.dot_dimension_numbers<[1], [0], [0], [1], [0, 0, 1, 1], [], []>} : vector<8x80xf32>, vector<80x64xf32>, vector<8x64xf32> -> vector<8x64xf32>
    %c0_38 = arith.constant 0 : index
    %c0_39 = arith.constant 0 : index
    %51 = vector.load %arg11[%c0_38, %c0_39] : memref<1x64xf32, #tpu.memory_space<vmem>>, vector<1x64xf32>
    %52 = vector.broadcast %51 : vector<1x64xf32> to vector<8x64xf32>
    %53 = arith.addf %50, %52 : vector<8x64xf32>
    %cst_40 = arith.constant 0.000000e+00 : f32
    %54 = vector.broadcast %cst_40 : f32 to vector<8x64xf32>
    %55 = arith.cmpf ogt, %53, %54 : vector<8x64xf32>
    %cst_41 = arith.constant 0.000000e+00 : f32
    %56 = vector.broadcast %cst_41 : f32 to vector<8x64xf32>
    %57 = arith.minimumf %53, %56 : vector<8x64xf32>
    %58 = math.exp %57 : vector<8x64xf32>
    %cst_42 = arith.constant 1.000000e+00 : f32
    %59 = vector.broadcast %cst_42 : f32 to vector<8x64xf32>
    %60 = arith.subf %58, %59 : vector<8x64xf32>
    %61 = arith.select %55, %53, %60 : vector<8x64xi1>, vector<8x64xf32>
    %c0_43 = arith.constant 0 : index
    %c0_44 = arith.constant 0 : index
    %62 = vector.load %arg12[%c0_43, %c0_44] : memref<160x64xf32, #tpu.memory_space<vmem>>, vector<160x64xf32>
    %cst_45 = arith.constant dense<0.000000e+00> : vector<8x64xf32>
    %63 = tpu.matmul %1, %62, %cst_45 {dimension_numbers = #tpu.dot_dimension_numbers<[1], [0], [0], [1], [0, 0, 1, 1], [], []>} : vector<8x160xf32>, vector<160x64xf32>, vector<8x64xf32> -> vector<8x64xf32>
    %c0_46 = arith.constant 0 : index
    %c0_47 = arith.constant 0 : index
    %64 = vector.load %arg13[%c0_46, %c0_47] : memref<1x64xf32, #tpu.memory_space<vmem>>, vector<1x64xf32>
    %65 = vector.broadcast %64 : vector<1x64xf32> to vector<8x64xf32>
    %66 = arith.addf %63, %65 : vector<8x64xf32>
    %cst_48 = arith.constant 0.000000e+00 : f32
    %67 = vector.broadcast %cst_48 : f32 to vector<8x64xf32>
    %68 = arith.cmpf ogt, %66, %67 : vector<8x64xf32>
    %cst_49 = arith.constant 0.000000e+00 : f32
    %69 = vector.broadcast %cst_49 : f32 to vector<8x64xf32>
    %70 = arith.minimumf %66, %69 : vector<8x64xf32>
    %71 = math.exp %70 : vector<8x64xf32>
    %cst_50 = arith.constant 1.000000e+00 : f32
    %72 = vector.broadcast %cst_50 : f32 to vector<8x64xf32>
    %73 = arith.subf %71, %72 : vector<8x64xf32>
    %74 = arith.select %68, %66, %73 : vector<8x64xi1>, vector<8x64xf32>
    %c0_51 = arith.constant 0 : index
    %c0_52 = arith.constant 0 : index
    %75 = vector.load %arg14[%c0_51, %c0_52] : memref<768x128xf32, #tpu.memory_space<vmem>>, vector<768x128xf32>
    %cst_53 = arith.constant dense<0.000000e+00> : vector<8x128xf32>
    %76 = tpu.matmul %2, %75, %cst_53 {dimension_numbers = #tpu.dot_dimension_numbers<[1], [0], [0], [1], [0, 0, 1, 1], [], []>} : vector<8x768xf32>, vector<768x128xf32>, vector<8x128xf32> -> vector<8x128xf32>
    %c0_54 = arith.constant 0 : index
    %c0_55 = arith.constant 0 : index
    %77 = vector.load %arg15[%c0_54, %c0_55] : memref<1x128xf32, #tpu.memory_space<vmem>>, vector<1x128xf32>
    %78 = vector.broadcast %77 : vector<1x128xf32> to vector<8x128xf32>
    %79 = arith.addf %76, %78 : vector<8x128xf32>
    %cst_56 = arith.constant 0.000000e+00 : f32
    %80 = vector.broadcast %cst_56 : f32 to vector<8x128xf32>
    %81 = arith.cmpf ogt, %79, %80 : vector<8x128xf32>
    %cst_57 = arith.constant 0.000000e+00 : f32
    %82 = vector.broadcast %cst_57 : f32 to vector<8x128xf32>
    %83 = arith.minimumf %79, %82 : vector<8x128xf32>
    %84 = math.exp %83 : vector<8x128xf32>
    %cst_58 = arith.constant 1.000000e+00 : f32
    %85 = vector.broadcast %cst_58 : f32 to vector<8x128xf32>
    %86 = arith.subf %84, %85 : vector<8x128xf32>
    %87 = arith.select %81, %79, %86 : vector<8x128xi1>, vector<8x128xf32>
    %88 = tpu.concatenate %61, %74, %87 in 1 : vector<8x64xf32>, vector<8x64xf32>, vector<8x128xf32> -> vector<8x256xf32>
    %c0_59 = arith.constant 0 : index
    %c0_60 = arith.constant 0 : index
    %89 = vector.load %arg18[%c0_59, %c0_60] : memref<8x256xf32, #tpu.memory_space<vmem>>, vector<8x256xf32>
    tpu.vector_store %arg18[%c0_59, %c0_60], %88 {strides = array<i32>} : memref<8x256xf32, #tpu.memory_space<vmem>>, vector<8x256xf32>,
    return
  }
  func.func @transform_0(%arg0: i32) -> (i32, i32) {
    %c0_i32 = arith.constant 0 : i32
    %c0_i32_0 = arith.constant 0 : i32
    %c0_i32_1 = arith.constant 0 : i32
    return %c0_i32, %c0_i32_0 : i32, i32
  }
  func.func @transform_1(%arg0: i32) -> (i32, i32) {
    %c0_i32 = arith.constant 0 : i32
    %c0_i32_0 = arith.constant 0 : i32
    %c0_i32_1 = arith.constant 0 : i32
    return %c0_i32, %c0_i32_0 : i32, i32
  }
  func.func @transform_2(%arg0: i32) -> (i32, i32) {
    %c0_i32 = arith.constant 0 : i32
    %c0_i32_0 = arith.constant 0 : i32
    %c0_i32_1 = arith.constant 0 : i32
    return %c0_i32, %c0_i32_0 : i32, i32
  }
  func.func @transform_3(%arg0: i32) -> (i32, i32) {
    %c0_i32 = arith.constant 0 : i32
    %c0_i32_0 = arith.constant 0 : i32
    %c0_i32_1 = arith.constant 0 : i32
    return %c0_i32, %c0_i32_0 : i32, i32
  }
  func.func @transform_4(%arg0: i32) -> (i32, i32) {
    %c0_i32 = arith.constant 0 : i32
    %c0_i32_0 = arith.constant 0 : i32
    %c0_i32_1 = arith.constant 0 : i32
    return %c0_i32, %c0_i32_0 : i32, i32
  }
  func.func @transform_5(%arg0: i32) -> (i32, i32) {
    %c0_i32 = arith.constant 0 : i32
    %c0_i32_0 = arith.constant 0 : i32
    %c0_i32_1 = arith.constant 0 : i32
    return %c0_i32, %c0_i32_0 : i32, i32
  }
  func.func @transform_6(%arg0: i32) -> (i32, i32) {
    %c0_i32 = arith.constant 0 : i32
    %c0_i32_0 = arith.constant 0 : i32
    %c0_i32_1 = arith.constant 0 : i32
    return %c0_i32, %c0_i32_0 : i32, i32
  }
  func.func @transform_7(%arg0: i32) -> (i32, i32) {
    %c0_i32 = arith.constant 0 : i32
    %c0_i32_0 = arith.constant 0 : i32
    %c0_i32_1 = arith.constant 0 : i32
    return %c0_i32, %c0_i32_0 : i32, i32
  }
  func.func @transform_8(%arg0: i32) -> (i32, i32) {
    %c0_i32 = arith.constant 0 : i32
    %c0_i32_0 = arith.constant 0 : i32
    %c0_i32_1 = arith.constant 0 : i32
    return %c0_i32, %c0_i32_0 : i32, i32
  }
  func.func @transform_9(%arg0: i32) -> (i32, i32) {
    %c0_i32 = arith.constant 0 : i32
    %c0_i32_0 = arith.constant 0 : i32
    %c0_i32_1 = arith.constant 0 : i32
    return %c0_i32, %c0_i32_0 : i32, i32
  }
  func.func @transform_10(%arg0: i32) -> (i32, i32) {
    %c0_i32 = arith.constant 0 : i32
    %c0_i32_0 = arith.constant 0 : i32
    %c0_i32_1 = arith.constant 0 : i32
    return %c0_i32, %c0_i32_0 : i32, i32
  }
  func.func @transform_11(%arg0: i32) -> (i32, i32) {
    %c0_i32 = arith.constant 0 : i32
    %c0_i32_0 = arith.constant 0 : i32
    %c0_i32_1 = arith.constant 0 : i32
    return %c0_i32, %c0_i32_0 : i32, i32
  }
  func.func @transform_12(%arg0: i32) -> (i32, i32) {
    %c0_i32 = arith.constant 0 : i32
    %c0_i32_0 = arith.constant 0 : i32
    %c0_i32_1 = arith.constant 0 : i32
    return %c0_i32, %c0_i32_0 : i32, i32
  }
  func.func @transform_13(%arg0: i32) -> (i32, i32) {
    %c0_i32 = arith.constant 0 : i32
    %c0_i32_0 = arith.constant 0 : i32
    %c0_i32_1 = arith.constant 0 : i32
    return %c0_i32, %c0_i32_0 : i32, i32
  }
  func.func @transform_14(%arg0: i32) -> (i32, i32) {
    %c0_i32 = arith.constant 0 : i32
    %c0_i32_0 = arith.constant 0 : i32
    %c0_i32_1 = arith.constant 0 : i32
    return %c0_i32, %c0_i32_0 : i32, i32
  }
  func.func @transform_15(%arg0: i32) -> (i32, i32) {
    %c0_i32 = arith.constant 0 : i32
    %c0_i32_0 = arith.constant 0 : i32
    %c0_i32_1 = arith.constant 0 : i32
    return %c0_i32, %c0_i32_0 : i32, i32
  }
  func.func @transform_16(%arg0: i32) -> (i32, i32) {
    %c0_i32 = arith.constant 0 : i32
    %c0_i32_0 = arith.constant 0 : i32
    %c0_i32_1 = arith.constant 0 : i32
    return %c0_i32, %c0_i32_0 : i32, i32
  }
  func.func @transform_17(%arg0: i32) -> (i32, i32) {
    %c0_i32 = arith.constant 0 : i32
    %c0_i32_0 = arith.constant 0 : i32
    %c0_i32_1 = arith.constant 0 : i32
    return %c0_i32, %c0_i32_0 : i32, i32
  }
  func.func @transform_18(%arg0: i32) -> (i32, i32) {
    %c0_i32 = arith.constant 0 : i32
    %c0_i32_0 = arith.constant 0 : i32
    %c0_i32_1 = arith.constant 0 : i32
    return %c0_i32, %c0_i32_0 : i32, i32
  }
}

</mosaic_0001>

<bundles_post_ra>
// kernel: tpu_custom_call.1
= control target key start
LH: loop header
LB: loop body
LE: loop exit
PB: predicated region body
PF: predicated region fallthrough
CT: control target
= control target key end

     0   :  { %s3281_s0 = inlined_call_operand.hbm [shape: f32[8,80], index: 0, kind: input, shape index: {}]   ;;  %s3282_s1 = inlined_call_operand.hbm [shape: f32[8,160], index: 1, kind: input, shape index: {}]   ;;  %s3283_s2 = inlined_call_operand.hbm [shape: f32[8,768], index: 2, kind: input, shape index: {}]   ;;  %s3284_s3 = inlined_call_operand.vmem [shape: f32[80,64], index: 3, kind: input, shape index: {}]   ;;  %s3285_s4 = inlined_call_operand.vmem [shape: f32[1,64], index: 4, kind: input, shape index: {}]   ;;  %s3286_s5 = inlined_call_operand.vmem [shape: f32[160,64], index: 5, kind: input, shape index: {}]   ;;  %s3287_s6 = inlined_call_operand.hbm [shape: f32[1,64], index: 6, kind: input, shape index: {}]   ;;  %s3288_s7 = inlined_call_operand.vmem [shape: f32[768,128], index: 7, kind: input, shape index: {}]   ;;  %s3289_s8 = inlined_call_operand.hbm [shape: f32[1,128], index: 8, kind: input, shape index: {}]   ;;  %s3290_s9 = inlined_call_operand.vmem [shape: f32[80,64], index: 9, kind: input, shape index: {}]   ;;  %s3291_s10 = inlined_call_operand.hbm [shape: f32[1,64], index: 10, kind: input, shape index: {}]   ;;  %s3292_s11 = inlined_call_operand.vmem [shape: f32[160,64], index: 11, kind: input, shape index: {}]   ;;  %s3293_s12 = inlined_call_operand.vmem [shape: f32[1,64], index: 12, kind: input, shape index: {}]   ;;  %s3294_s13 = inlined_call_operand.hbm [shape: f32[768,128], index: 13, kind: input, shape index: {}]   ;;  %s3295_s14 = inlined_call_operand.vmem [shape: f32[1,128], index: 14, kind: input, shape index: {}]   ;;  %s3296_s15 = inlined_call_operand.hbm [shape: f32[256,512], index: 15, kind: input, shape index: {}]   ;;  %s3297_s16 = inlined_call_operand.vmem [shape: f32[1,512], index: 16, kind: input, shape index: {}]   ;;  %s3298_s17 = inlined_call_operand.hbm [shape: f32[8,256], index: 17, kind: output, shape index: {0}]   ;;  %s3299_s18 = inlined_call_operand.hbm [shape: f32[8,512], index: 18, kind: output, shape index: {1}]  }
   0x1   :  { %3303 = sst [smem:[#allocation26_spill]] %s3281_s0 }
   0x2   :  { %3304 = sst [smem:[#allocation27_spill]] %s3282_s1 }
   0x3   :  { %3305 = sst [smem:[#allocation28_spill]] %s3283_s2 }
   0x4   :  { %24 = vsyncpa [#allocation3], 0 }
   0x5   :  { %25 = vsyncpa [#allocation6], 0 }
   0x6   :  { %26 = vsyncpa [#allocation9], 0 }
   0x7   :  { %27 = vsyncpa [#allocation12], 0 }
   0x8   :  { %28 = vsyncpa [#allocation15], 0 }
   0x9   :  { %29 = vsyncpa [#allocation4], 0 }
   0xa   :  { %30 = vsyncpa [#allocation18], 0  ;;  %s2523_s27 = smov [#allocation5]   ;;  %s2524_s29 = smov [#allocation8]  }
   0xb   :  { %s47_s28 = sshll.u32 %s2523_s27, 4  ;;  %s73_s30 = sshll.u32 %s2524_s29, 4  ;;  %s48_s28 = int_to_ptr.vmem [resolvable:$true] %s47_s28  ;;  %s74_s30 = int_to_ptr.vmem [resolvable:$true] %s73_s30 }
   0xc   :  { %s3306_s1 = sld [smem:[#allocation27_spill]] }
  0x12   :  { %s2289_s20 = scalar_lea.hbm %s3306_s1, 256 }
  0x13   :  { %p2290_p0 = scmp.ne.s32.totalorder %s3306_s1, %s2289_s20  ;;  %p2293_p1 = scmp.lt.u32.totalorder %s2289_s20, %s3306_s1 }
  0x15   :  { %p2295_p2 = pnand %p2293_p1, %p2290_p0 }
  0x17   :  { %2298 = shalt.err (!%p2295_p2)
}
  0x18   :  { %s2299_s24 = scalar_lea.vmem %s48_s28, 256  ;;  %p2304_p4 = scmp.lt.s32.totalorder %s48_s28, %s48_s28 }
  0x19   :  { %p2300_p3 = scmp.ne.s32.totalorder %s48_s28, %s2299_s24  ;;  %p2305_p5 = scmp.lt.s32.totalorder %s2299_s24, %s2299_s24 }
  0x1b   :  { %p2306_p6 = por %p2305_p5, %p2304_p4 }
  0x1d   :  { %p2307_p7 = pnand %p2306_p6, %p2300_p3 }
  0x1f   :  { %2310 = shalt.err (!%p2307_p7)
}
  0x20   :  { %50 = dma.hbm_to_vmem [thread:$0]  %s3306_s1, 256, %s48_s28, [#allocation6]  }
  0x21   :  { %s2311_s0 = scalar_lea.hbm %s3287_s6, 16 }
  0x22   :  { %p2312_p8 = scmp.ne.s32.totalorder %s3287_s6, %s2311_s0  ;;  %p2315_p9 = scmp.lt.u32.totalorder %s2311_s0, %s3287_s6 }
  0x24   :  { %p2317_p10 = pnand %p2315_p9, %p2312_p8 }
  0x26   :  { %2320 = shalt.err (!%p2317_p10)
}
  0x27   :  { %s2321_s2 = scalar_lea.vmem %s74_s30, 16  ;;  %s2325_s23 = scalar_lea.vmem %s74_s30, 32 }
  0x28   :  { %p2322_p11 = scmp.ne.s32.totalorder %s74_s30, %s2321_s2  ;;  %p2326_p12 = scmp.lt.s32.totalorder %s74_s30, %s74_s30 }
  0x29   :  { %p2327_p13 = scmp.lt.s32.totalorder %s2325_s23, %s2321_s2 }
  0x2b   :  { %p2328_p0 = por %p2327_p13, %p2326_p12 }
  0x2d   :  { %p2329_p1 = pnand %p2328_p0, %p2322_p11 }
  0x2f   :  { %2332 = shalt.err (!%p2329_p1)
}
  0x30   :  { %76 = dma.hbm_to_vmem [thread:$0]  %s3287_s6, 16, %s74_s30, [#allocation9]  }
  0x31   :  { %s2525_s24 = smov [#allocation11]   ;;  %s2526_s26 = smov [#allocation2]  }
  0x32   :  { %s97_s25 = sshll.u32 %s2525_s24, 4  ;;  %s37_s27 = sshll.u32 %s2526_s26, 4  ;;  %s98_s25 = int_to_ptr.vmem [resolvable:$true] %s97_s25  ;;  %s38_s27 = int_to_ptr.vmem [resolvable:$true] %s37_s27 }
  0x33   :  { %s2333_s19 = scalar_lea.hbm %s3291_s10, 16 }
  0x34   :  { %p2334_p2 = scmp.ne.s32.totalorder %s3291_s10, %s2333_s19  ;;  %p2337_p3 = scmp.lt.u32.totalorder %s2333_s19, %s3291_s10 }
  0x36   :  { %p2339_p4 = pnand %p2337_p3, %p2334_p2 }
  0x38   :  { %2342 = shalt.err (!%p2339_p4)
}
  0x39   :  { %s2343_s6 = scalar_lea.vmem %s98_s25, 16  ;;  %s2347_s30 = scalar_lea.vmem %s98_s25, 32 }
  0x3a   :  { %p2344_p5 = scmp.ne.s32.totalorder %s98_s25, %s2343_s6  ;;  %p2348_p6 = scmp.lt.s32.totalorder %s98_s25, %s98_s25 }
  0x3b   :  { %p2349_p7 = scmp.lt.s32.totalorder %s2347_s30, %s2343_s6 }
  0x3d   :  { %p2350_p8 = por %p2349_p7, %p2348_p6 }
  0x3f   :  { %p2351_p9 = pnand %p2350_p8, %p2344_p5 }
  0x41   :  { %2354 = shalt.err (!%p2351_p9)
}
  0x42   :  { %100 = dma.hbm_to_vmem [thread:$0]  %s3291_s10, 16, %s98_s25, [#allocation12]  }
  0x43   :  { %s3307_s26 = sld [smem:[#allocation26_spill]] }
  0x49   :  { %s2355_s29 = scalar_lea.hbm %s3307_s26, 128 }
  0x4a   :  { %p2356_p10 = scmp.ne.s32.totalorder %s3307_s26, %s2355_s29  ;;  %p2359_p11 = scmp.lt.u32.totalorder %s2355_s29, %s3307_s26 }
  0x4c   :  { %p2361_p12 = pnand %p2359_p11, %p2356_p10 }
  0x4e   :  { %2364 = shalt.err (!%p2361_p12)
}
  0x4f   :  { %s2365_s22 = scalar_lea.vmem %s38_s27, 128  ;;  %p2370_p0 = scmp.lt.s32.totalorder %s38_s27, %s38_s27 }
  0x50   :  { %p2366_p13 = scmp.ne.s32.totalorder %s38_s27, %s2365_s22  ;;  %p2371_p1 = scmp.lt.s32.totalorder %s2365_s22, %s2365_s22 }
  0x52   :  { %p2372_p2 = por %p2371_p1, %p2370_p0 }
  0x54   :  { %p2373_p3 = pnand %p2372_p2, %p2366_p13 }
  0x56   :  { %2376 = shalt.err (!%p2373_p3)
}
  0x57   :  { %40 = dma.hbm_to_vmem [thread:$0]  %s3307_s26, 128, %s38_s27, [#allocation3]  }
  0x58   :  { %s2527_s2 = smov [#allocation7]   ;;  %s2528_s30 = smov [#allocation10]  }
  0x59   :  { %s57_s6 = sshll.u32 %s2527_s2, 4  ;;  %s85_s23 = sshll.u32 %s2528_s30, 4  ;;  %s58_s6 = int_to_ptr.vmem [resolvable:$true] %s57_s6  ;;  %s86_s23 = int_to_ptr.vmem [resolvable:$true] %s85_s23 }
  0x5a   :  { %s3308_s24 = sld [smem:[#allocation28_spill]] }
  0x60   :  { %s2377_s29 = scalar_lea.hbm %s3308_s24, 768 }
  0x61   :  { %p2378_p4 = scmp.ne.s32.totalorder %s3308_s24, %s2377_s29  ;;  %p2381_p5 = scmp.lt.u32.totalorder %s2377_s29, %s3308_s24 }
  0x63   :  { %p2383_p6 = pnand %p2381_p5, %p2378_p4 }
  0x65   :  { %2386 = shalt.err (!%p2383_p6)
}
  0x66   :  { %s2387_s27 = scalar_lea.vmem %s58_s6, 768  ;;  %p2392_p8 = scmp.lt.s32.totalorder %s58_s6, %s58_s6 }
  0x67   :  { %p2388_p7 = scmp.ne.s32.totalorder %s58_s6, %s2387_s27  ;;  %p2393_p9 = scmp.lt.s32.totalorder %s2387_s27, %s2387_s27 }
  0x69   :  { %p2394_p10 = por %p2393_p9, %p2392_p8 }
  0x6b   :  { %p2395_p11 = pnand %p2394_p10, %p2388_p7 }
  0x6d   :  { %2398 = shalt.err (!%p2395_p11)
}
  0x6e   :  { %60 = dma.hbm_to_vmem [thread:$0]  %s3308_s24, 768, %s58_s6, [#allocation6]  }
  0x6f   :  { %s2399_s2 = scalar_lea.hbm %s3289_s8, 16 }
  0x70   :  { %p2400_p12 = scmp.ne.s32.totalorder %s3289_s8, %s2399_s2  ;;  %p2403_p13 = scmp.lt.u32.totalorder %s2399_s2, %s3289_s8 }
  0x72   :  { %p2405_p0 = pnand %p2403_p13, %p2400_p12 }
  0x74   :  { %2408 = shalt.err (!%p2405_p0)
}
  0x75   :  { %s2409_s0 = scalar_lea.vmem %s86_s23, 16  ;;  %s2413_s19 = scalar_lea.vmem %s86_s23, 32 }
  0x76   :  { %p2410_p1 = scmp.ne.s32.totalorder %s86_s23, %s2409_s0  ;;  %p2414_p2 = scmp.lt.s32.totalorder %s86_s23, %s86_s23 }
  0x77   :  { %p2415_p3 = scmp.lt.s32.totalorder %s2413_s19, %s2409_s0 }
  0x79   :  { %p2416_p4 = por %p2415_p3, %p2414_p2 }
  0x7b   :  { %p2417_p5 = pnand %p2416_p4, %p2410_p1 }
  0x7d   :  { %2420 = shalt.err (!%p2417_p5)
}
  0x7e   :  { %88 = dma.hbm_to_vmem [thread:$0]  %s3289_s8, 16, %s86_s23, [#allocation9]  }
  0x7f   :  { %s2529_s21 = smov [#allocation13]   ;;  %s2421_s22 = scalar_lea.hbm %s3294_s13, 12288 }
  0x80   :  { %s110_s20 = sshll.u32 %s2529_s21, 4  ;;  %p2422_p6 = scmp.ne.s32.totalorder %s3294_s13, %s2421_s22  ;;  %s111_s20 = int_to_ptr.vmem [resolvable:$true] %s110_s20 }
  0x81   :  { %p2425_p7 = scmp.lt.u32.totalorder %s2421_s22, %s3294_s13 }
  0x83   :  { %p2427_p8 = pnand %p2425_p7, %p2422_p6 }
  0x85   :  { %2430 = shalt.err (!%p2427_p8)
}
  0x86   :  { %s2431_s28 = scalar_lea.vmem %s111_s20, 12288  ;;  %p2436_p10 = scmp.lt.s32.totalorder %s111_s20, %s111_s20 }
  0x87   :  { %p2432_p9 = scmp.ne.s32.totalorder %s111_s20, %s2431_s28  ;;  %p2437_p11 = scmp.lt.s32.totalorder %s2431_s28, %s2431_s28 }
  0x89   :  { %p2438_p12 = por %p2437_p11, %p2436_p10 }
  0x8b   :  { %p2439_p13 = pnand %p2438_p12, %p2432_p9 }
  0x8d   :  { %2442 = shalt.err (!%p2439_p13)
}
  0x8e   :  { %s2530_s8 = smov 128   ;;  %s2531_s23 = smov 8  }
  0x8f   :  { %116 = dma.hbm_to_vmem [thread:$0]  %s3294_s13, 12288, %s111_s20, [#allocation12], %s2530_s8, %s2530_s8, %s2531_s23  }
  0x90   :  { %s2532_s0 = smov [#allocation14]   ;;  %s2443_s21 = scalar_lea.hbm %s3296_s15, 16384 }
  0x91   :  { %s124_s19 = sshll.u32 %s2532_s0, 4  ;;  %p2444_p0 = scmp.ne.s32.totalorder %s3296_s15, %s2443_s21  ;;  %s125_s19 = int_to_ptr.vmem [resolvable:$true] %s124_s19 }
  0x92   :  { %p2447_p1 = scmp.lt.u32.totalorder %s2443_s21, %s3296_s15 }
  0x94   :  { %p2449_p2 = pnand %p2447_p1, %p2444_p0 }
  0x96   :  { %2452 = shalt.err (!%p2449_p2)
}
  0x97   :  { %s2453_s25 = scalar_lea.vmem %s125_s19, 16384  ;;  %p2458_p4 = scmp.lt.s32.totalorder %s125_s19, %s125_s19 }
  0x98   :  { %p2454_p3 = scmp.ne.s32.totalorder %s125_s19, %s2453_s25  ;;  %p2459_p5 = scmp.lt.s32.totalorder %s2453_s25, %s2453_s25 }
  0x9a   :  { %p2460_p6 = por %p2459_p5, %p2458_p4 }
  0x9c   :  { %p2461_p7 = pnand %p2460_p6, %p2454_p3 }
  0x9e   :  { %2464 = shalt.err (!%p2461_p7)
}
  0x9f   :  { %s2533_s13 = smov 512   ;;  %s2534_s20 = smov 32  }
  0xa0   :  { %130 = dma.hbm_to_vmem [thread:$0]  %s3296_s15, 16384, %s125_s19, [#allocation15], %s2533_s13, %s2533_s13, %s2534_s20  }
  0xa1   :  { %2509 = dma.done.wait [#allocation3], 128  }
  0xa2   :  { %2510 = vsyncadd [#allocation3], 4294967168 }
  0xa3   :  { %2511 = dma.done.wait [#allocation6], 1024  }
  0xa4   :  { %2512 = vsyncadd [#allocation6], 4294966272 }
  0xa5   :  { %2513 = dma.done.wait [#allocation9], 32  }
  0xa6   :  { %2514 = vsyncadd [#allocation9], 4294967264 }
  0xa7   :  { %2515 = dma.done.wait [#allocation12], 12304  }
  0xa8   :  { %2516 = vsyncadd [#allocation12], 4294954992 }
  0xa9   :  { %2517 = dma.done.wait [#allocation15], 16384  }
  0xaa   :  { %2518 = vsyncadd [#allocation15], 4294950912  ;;  %v2535_v0 = vmov 0.0|0.0   ;;  %vm2536_vm0 = vmmov 0   ;;  %v2537_v1 = vmov 0.0   ;;  %v263_v2 = vld [vmem:[%s3286_s5] sm:$0xff] }
  0xab   :  { %1855 = vmatprep.subr.bf16.mxu1 %v2535_v0  ;;  %1840 = vmatprep.subr.bf16.mxu0 %v2535_v0  ;;  %v264_v3 = vld [vmem:[%s3286_s5 + $0x8] sm:$0xff]  ;;  %v265_v4 = vld [vmem:[%s3286_s5 + $0x10] sm:$0xff]  ;;  %v266_v6 = vld [vmem:[%s3286_s5 + $0x18] sm:$0xff]  ;;  %vm290_vm1 = vcmask 261120   ;;  %vm183_vm2 = vcmask 654336   ;;  %vm693_vm6 = vcmask 523264  }
  0xac   :  { %1814 = vmatprep.mubr.msk.f32.mxu0 %vm2536_vm0, %v2537_v1  ;;  %v1856_v5 = vpack.c.bf16 %v264_v3, %v263_v2  ;;  %v1859_v7 = vpack.c.bf16 %v266_v6, %v265_v4  ;;  %v267_v8 = vld [vmem:[%s3286_s5 + $0x20] sm:$0xff]  ;;  %v268_v9 = vld [vmem:[%s3286_s5 + $0x28] sm:$0xff]  ;;  %v168_v13 = vld [vmem:[%s3284_s3 + $0x10] sm:$0xff]  ;;  %s2539_s21 = smov [#allocation17]  }
  0xad   :  { %v166_v10 = vld [vmem:[%s3284_s3] sm:$0xff]  ;;  %v167_v11 = vld [vmem:[%s3284_s3 + $0x8] sm:$0xff]  ;;  %v169_v14 = vld [vmem:[%s3284_s3 + $0x18] sm:$0xff]  ;;  %v1862_v15 = vpack.c.bf16 %v268_v9, %v267_v8 }
  0xae   :  { %1857 = vmatpush1.bf16.msra.mxu1 %v1856_v5  ;;  %v1841_v12 = vpack.c.bf16 %v167_v11, %v166_v10  ;;  %v269_v16 = vld [vmem:[%s3286_s5 + $0x30] sm:$0xff]  ;;  %v1844_v17 = vpack.c.bf16 %v169_v14, %v168_v13  ;;  %v270_v18 = vld [vmem:[%s3286_s5 + $0x38] sm:$0xff]  ;;  %v170_v19 = vld [vmem:[%s3284_s3 + $0x20] sm:$0xff] }
  0xaf   :  { %1858 = vmatprep.subr.bf16.mxu1 %v2535_v0  ;;  %v171_v20 = vld [vmem:[%s3284_s3 + $0x28] sm:$0xff]  ;;  %v159_v21 = vld [vmem:[#allocation5 + $0x8] sm:$0xff]  ;;  %v1865_v22 = vpack.c.bf16 %v270_v18, %v269_v16  ;;  %v271_v23 = vld [vmem:[%s3286_s5 + $0x40] sm:$0xff] }
  0xb0   :  { %1842 = vmatpush3.bf16.msra.mxu0 %v1841_v12  ;;  %1550 = vmatprep.mubr.msk.f32.mxu1 %vm290_vm1, %v159_v21  ;;  %v1847_v24 = vpack.c.bf16 %v171_v20, %v170_v19  ;;  %v272_v25 = vld [vmem:[%s3286_s5 + $0x48] sm:$0xff]  ;;  %v172_v26 = vld [vmem:[%s3284_s3 + $0x30] sm:$0xff]  ;;  %v173_v27 = vld [vmem:[%s3284_s3 + $0x38] sm:$0xff] }
  0xb1   :  { %1843 = vmatprep.subr.bf16.mxu0 %v2535_v0  ;;  %v1868_v28 = vpack.c.bf16 %v272_v25, %v271_v23  ;;  %v273_v29 = vld [vmem:[%s3286_s5 + $0x50] sm:$0xff]  ;;  %v1850_v30 = vpack.c.bf16 %v173_v27, %v172_v26  ;;  %v274_v31 = vld [vmem:[%s3286_s5 + $0x58] sm:$0xff]  ;;  %v174_v32 = vld [vmem:[%s3284_s3 + $0x40] sm:$0xff] }
  0xb2   :  { %1860 = vmatpush1.bf16.msra.mxu1 %v1859_v7  ;;  %v175_v33 = vld [vmem:[%s3284_s3 + $0x48] sm:$0xff]  ;;  %v386_v34 = vld [vmem:[%s3288_s7 + $0x80] sm:$0xff]  ;;  %v1871_v36 = vpack.c.bf16 %v274_v31, %v273_v29  ;;  %v388_v43 = vld [vmem:[%s3288_s7 + $0x90] sm:$0xff]  ;;  %s1529_s3 = sshll.u32 %s2539_s21, 4  ;;  %s1530_s3 = int_to_ptr.vmem [resolvable:$true] %s1529_s3 }
  0xb3   :  { %1861 = vmatprep.subr.bf16.mxu1 %v2535_v0  ;;  %v387_v35 = vld [vmem:[%s3288_s7 + $0x88] sm:$0xff]  ;;  %v275_v37 = vld [vmem:[%s3286_s5 + $0x60] sm:$0xff]  ;;  %v1853_v38 = vpack.c.bf16 %v175_v33, %v174_v32  ;;  %v389_v44 = vld [vmem:[%s3288_s7 + $0x98] sm:$0xff]  ;;  %s2465_s27 = scalar_lea.vmem %s1530_s3, 512  ;;  %p2470_p9 = scmp.lt.s32.totalorder %s1530_s3, %s1530_s3 }
  0xb4   :  { %1845 = vmatpush3.bf16.msra.mxu0 %v1844_v17  ;;  %v276_v39 = vld [vmem:[%s3286_s5 + $0x68] sm:$0xff]  ;;  %v1885_v40 = vpack.c.bf16 %v387_v35, %v386_v34  ;;  %v370_v41 = vld [vmem:[%s3288_s7] sm:$0xff]  ;;  %v277_v46 = vld [vmem:[%s3286_s5 + $0x70] sm:$0xff]  ;;  %v1889_v50 = vpack.c.bf16 %v389_v44, %v388_v43  ;;  %p2466_p8 = scmp.ne.s32.totalorder %s1530_s3, %s2465_s27  ;;  %p2471_p10 = scmp.lt.s32.totalorder %s2465_s27, %s2465_s27 }
  0xb5   :  { %1846 = vmatprep.subr.bf16.mxu0 %v2535_v0  ;;  %v371_v42 = vld [vmem:[%s3288_s7 + $0x8] sm:$0xff]  ;;  %v1874_v45 = vpack.c.bf16 %v276_v39, %v275_v37  ;;  %v157_v47 = vld [vmem:[#allocation2] sm:$0xff]  ;;  %v278_v49 = vld [vmem:[%s3286_s5 + $0x78] sm:$0xff] }
  0xb6   :  { %1863 = vmatpush1.bf16.msra.mxu1 %v1862_v15  ;;  %v1887_v48 = vpack.c.bf16 %v371_v42, %v370_v41  ;;  %v372_v51 = vld [vmem:[%s3288_s7 + $0x10] sm:$0xff]  ;;  %v373_v52 = vld [vmem:[%s3288_s7 + $0x18] sm:$0xff]  ;;  %v390_v53 = vld [vmem:[%s3288_s7 + $0xa0] sm:$0xff]  ;;  %v1877_v56 = vpack.c.bf16 %v278_v49, %v277_v46  ;;  %p2472_p11 = por %p2471_p10, %p2470_p9 }
  0xb7   :  { %1864 = vmatprep.subr.bf16.mxu1 %v2535_v0  ;;  %v391_v54 = vld [vmem:[%s3288_s7 + $0xa8] sm:$0xff]  ;;  %v161_v55 = vld [vmem:[#allocation7 + $0x8] sm:$0xff]  ;;  %v1891_v58 = vpack.c.bf16 %v373_v52, %v372_v51  ;;  %v392_v63 = vld [vmem:[%s3288_s7 + $0xb0] sm:$0xff] }
  0xb8   :  { %1848 = vmatpush3.bf16.msra.mxu0 %v1847_v24  ;;  %v279_v57 = vld [vmem:[%s3286_s5 + $0x80] sm:$0xff]  ;;  %v280_v59 = vld [vmem:[%s3286_s5 + $0x88] sm:$0xff]  ;;  %v1893_v60 = vpack.c.bf16 %v391_v54, %v390_v53  ;;  %v393_v2 = vld [vmem:[%s3288_s7 + $0xb8] sm:$0xff]  ;;  %p2473_p12 = pnand %p2472_p11, %p2466_p8 }
  0xb9   :  { %1849 = vmatprep.subr.bf16.mxu0 %v2535_v0  ;;  %v374_v61 = vld [vmem:[%s3288_s7 + $0x20] sm:$0xff]  ;;  %v375_v62 = vld [vmem:[%s3288_s7 + $0x28] sm:$0xff]  ;;  %v1880_v3 = vpack.c.bf16 %v280_v59, %v279_v57  ;;  %v281_v4 = vld [vmem:[%s3286_s5 + $0x90] sm:$0xff]  ;;  %v1897_v7 = vpack.c.bf16 %v393_v2, %v392_v63 }
  0xba   :  { %1866 = vmatpush1.bf16.msra.mxu1 %v1865_v22  ;;  %v282_v5 = vld [vmem:[%s3286_s5 + $0x98] sm:$0xff]  ;;  %v1895_v6 = vpack.c.bf16 %v375_v62, %v374_v61  ;;  %v376_v8 = vld [vmem:[%s3288_s7 + $0x30] sm:$0xff]  ;;  %v394_v10 = vld [vmem:[%s3288_s7 + $0xc0] sm:$0xff] }
  0xbb   :  { %1867 = vmatprep.subr.bf16.mxu1 %v2535_v0  ;;  %v377_v9 = vld [vmem:[%s3288_s7 + $0x38] sm:$0xff]  ;;  %v395_v11 = vld [vmem:[%s3288_s7 + $0xc8] sm:$0xff]  ;;  %v418_v12 = vld [vmem:[%s3288_s7 + $0x180] sm:$0xff]  ;;  %v1883_v14 = vpack.c.bf16 %v282_v5, %v281_v4 }
  0xbc   :  { %1851 = vmatpush3.bf16.msra.mxu0 %v1850_v30  ;;  %v419_v13 = vld [vmem:[%s3288_s7 + $0x188] sm:$0xff]  ;;  %v1899_v15 = vpack.c.bf16 %v377_v9, %v376_v8  ;;  %v378_v16 = vld [vmem:[%s3288_s7 + $0x40] sm:$0xff]  ;;  %v1901_v18 = vpack.c.bf16 %v395_v11, %v394_v10  ;;  %v396_v19 = vld [vmem:[%s3288_s7 + $0xd0] sm:$0xff] }
  0xbd   :  { %1852 = vmatprep.subr.bf16.mxu0 %v2535_v0  ;;  %v379_v17 = vld [vmem:[%s3288_s7 + $0x48] sm:$0xff]  ;;  %v1917_v20 = vpack.c.bf16 %v419_v13, %v418_v12  ;;  %v402_v21 = vld [vmem:[%s3288_s7 + $0x100] sm:$0xff]  ;;  %v397_v23 = vld [vmem:[%s3288_s7 + $0xd8] sm:$0xff] }
  0xbe   :  { %1869 = vmatpush1.bf16.msra.mxu1 %v1868_v28  ;;  %v403_v22 = vld [vmem:[%s3288_s7 + $0x108] sm:$0xff]  ;;  %v420_v24 = vld [vmem:[%s3288_s7 + $0x190] sm:$0xff]  ;;  %v421_v25 = vld [vmem:[%s3288_s7 + $0x198] sm:$0xff]  ;;  %v1903_v27 = vpack.c.bf16 %v379_v17, %v378_v16  ;;  %v1905_v31 = vpack.c.bf16 %v397_v23, %v396_v19 }
  0xbf   :  { %1870 = vmatprep.subr.bf16.mxu1 %v2535_v0  ;;  %v158_v26 = vld [vmem:[#allocation5] sm:$0xff]  ;;  %v380_v28 = vld [vmem:[%s3288_s7 + $0x50] sm:$0xff]  ;;  %v381_v29 = vld [vmem:[%s3288_s7 + $0x58] sm:$0xff]  ;;  %v1919_v30 = vpack.c.bf16 %v403_v22, %v402_v21  ;;  %v1921_v33 = vpack.c.bf16 %v421_v25, %v420_v24 }
  0xc0   :  { %1854 = vmatpush3.bf16.msra.mxu0 %v1853_v38  ;;  %v398_v32 = vld [vmem:[%s3288_s7 + $0xe0] sm:$0xff]  ;;  %v404_v34 = vld [vmem:[%s3288_s7 + $0x110] sm:$0xff]  ;;  %v405_v35 = vld [vmem:[%s3288_s7 + $0x118] sm:$0xff]  ;;  %v1907_v39 = vpack.c.bf16 %v381_v29, %v380_v28 }
  0xc1   :  { %1886 = vmatprep.subr.bf16.mxu0 %v1885_v40  ;;  %v422_v37 = vld [vmem:[%s3288_s7 + $0x1a0] sm:$0xff]  ;;  %v423_v38 = vld [vmem:[%s3288_s7 + $0x1a8] sm:$0xff]  ;;  %v1923_v42 = vpack.c.bf16 %v405_v35, %v404_v34  ;;  %v163_v43 = vld [vmem:[#allocation7 + $0x18] sm:$0xff] }
  0xc2   :  { %1872 = vmatpush1.bf16.msra.mxu1 %v1871_v36  ;;  %v399_v36 = vld [vmem:[%s3288_s7 + $0xe8] sm:$0xff]  ;;  %v382_v40 = vld [vmem:[%s3288_s7 + $0x60] sm:$0xff]  ;;  %v1925_v46 = vpack.c.bf16 %v423_v38, %v422_v37  ;;  %v401_v49 = vld [vmem:[%s3288_s7 + $0xf8] sm:$0xff] }
  0xc3   :  { %1873 = vmatprep.subr.bf16.mxu1 %v2535_v0  ;;  %1815 = vmatmul.mubr.msk.f32.vlgmr.msra.gmra.mrb[0].mxu0 %vm183_vm2, %v157_v47  ;;  %v383_v41 = vld [vmem:[%s3288_s7 + $0x68] sm:$0xff]  ;;  %v1909_v44 = vpack.c.bf16 %v399_v36, %v398_v32  ;;  %v406_v47 = vld [vmem:[%s3288_s7 + $0x120] sm:$0xff]  ;;  %v425_v51 = vld [vmem:[%s3288_s7 + $0x1b8] sm:$0xff] }
  0xc4   :  { %1888 = vmatpush3.bf16.msra.mxu0 %v1887_v48  ;;  %537 = vmatprep.mubr.f32.mxu0 %v161_v55  ;;  %v407_v48 = vld [vmem:[%s3288_s7 + $0x128] sm:$0xff]  ;;  %v1911_v52 = vpack.c.bf16 %v383_v41, %v382_v40  ;;  %v384_v53 = vld [vmem:[%s3288_s7 + $0x70] sm:$0xff]  ;;  %v385_v54 = vld [vmem:[%s3288_s7 + $0x78] sm:$0xff] }
  0xc5   :  { %1890 = vmatprep.subr.bf16.mxu0 %v1889_v50  ;;  %v424_v50 = vld [vmem:[%s3288_s7 + $0x1b0] sm:$0xff]  ;;  %v1927_v55 = vpack.c.bf16 %v407_v48, %v406_v47  ;;  %v450_v57 = vld [vmem:[%s3288_s7 + $0x280] sm:$0xff]  ;;  %v451_v61 = vld [vmem:[%s3288_s7 + $0x288] sm:$0xff]  ;;  %v1915_v2 = vpack.c.bf16 %v385_v54, %v384_v53 }
  0xc6   :  { %1875 = vmatpush1.bf16.msra.mxu1 %v1874_v45  ;;  %v400_v45 = vld [vmem:[%s3288_s7 + $0xf0] sm:$0xff]  ;;  %v426_v62 = vld [vmem:[%s3288_s7 + $0x1c0] sm:$0xff]  ;;  %v427_v63 = vld [vmem:[%s3288_s7 + $0x1c8] sm:$0xff] }
  0xc7   :  { %1876 = vmatprep.subr.bf16.mxu1 %v2535_v0  ;;  %v408_v59 = vld [vmem:[%s3288_s7 + $0x130] sm:$0xff]  ;;  %v435_v4 = vld [vmem:[%s3288_s7 + $0x208] sm:$0xff]  ;;  %v1933_v8 = vpack.c.bf16 %v427_v63, %v426_v62  ;;  %v410_v9 = vld [vmem:[%s3288_s7 + $0x140] sm:$0xff] }
  0xc8   :  { %1892 = vmatpush3.bf16.msra.mxu0 %v1891_v58  ;;  %v1929_v58 = vpack.c.bf16 %v425_v51, %v424_v50  ;;  %v411_v10 = vld [vmem:[%s3288_s7 + $0x148] sm:$0xff]  ;;  %v453_v11 = vld [vmem:[%s3288_s7 + $0x298] sm:$0xff]  ;;  %v428_v12 = vld [vmem:[%s3288_s7 + $0x1d0] sm:$0xff] }
  0xc9   :  { %1894 = vmatprep.subr.bf16.mxu0 %v1893_v60  ;;  %v409_v60 = vld [vmem:[%s3288_s7 + $0x138] sm:$0xff]  ;;  %v436_v16 = vld [vmem:[%s3288_s7 + $0x210] sm:$0xff]  ;;  %v455_v24 = vld [vmem:[%s3288_s7 + $0x2a8] sm:$0xff] }
  0xca   :  { %1878 = vmatpush1.bf16.msra.mxu1 %v1877_v56  ;;  %v1913_v56 = vpack.c.bf16 %v401_v49, %v400_v45  ;;  %v1931_v5 = vpack.c.bf16 %v409_v60, %v408_v59  ;;  %v429_v13 = vld [vmem:[%s3288_s7 + $0x1d8] sm:$0xff]  ;;  %v412_v22 = vld [vmem:[%s3288_s7 + $0x150] sm:$0xff]  ;;  %v430_v25 = vld [vmem:[%s3288_s7 + $0x1e0] sm:$0xff] }
  0xcb   :  { %1879 = vmatprep.subr.bf16.mxu1 %v2535_v0  ;;  %v437_v17 = vld [vmem:[%s3288_s7 + $0x218] sm:$0xff]  ;;  %v1937_v21 = vpack.c.bf16 %v429_v13, %v428_v12  ;;  %v438_v29 = vld [vmem:[%s3288_s7 + $0x220] sm:$0xff]  ;;  %v415_v36 = vld [vmem:[%s3288_s7 + $0x168] sm:$0xff] }
  0xcc   :  { %1896 = vmatpush3.bf16.msra.mxu0 %v1895_v6  ;;  %v1949_v6 = vpack.c.bf16 %v451_v61, %v450_v57  ;;  %v413_v23 = vld [vmem:[%s3288_s7 + $0x158] sm:$0xff]  ;;  %v1955_v28 = vpack.c.bf16 %v437_v17, %v436_v16  ;;  %v414_v35 = vld [vmem:[%s3288_s7 + $0x160] sm:$0xff]  ;;  %v432_v38 = vld [vmem:[%s3288_s7 + $0x1f0] sm:$0xff] }
  0xcd   :  { %1898 = vmatprep.subr.bf16.mxu0 %v1897_v7  ;;  %v452_v7 = vld [vmem:[%s3288_s7 + $0x290] sm:$0xff]  ;;  %v457_v37 = vld [vmem:[%s3288_s7 + $0x2b8] sm:$0xff]  ;;  %v458_v48 = vld [vmem:[%s3288_s7 + $0x2c0] sm:$0xff] }
  0xce   :  { %1881 = vmatpush1.bf16.msra.mxu1 %v1880_v3  ;;  %v434_v3 = vld [vmem:[%s3288_s7 + $0x200] sm:$0xff]  ;;  %v1953_v19 = vpack.c.bf16 %v453_v11, %v452_v7  ;;  %v440_v41 = vld [vmem:[%s3288_s7 + $0x230] sm:$0xff]  ;;  %v417_v47 = vld [vmem:[%s3288_s7 + $0x178] sm:$0xff] }
  0xcf   :  { %1882 = vmatprep.subr.bf16.mxu1 %v2535_v0  ;;  %v459_v49 = vld [vmem:[%s3288_s7 + $0x2c8] sm:$0xff]  ;;  %v442_v53 = vld [vmem:[%s3288_s7 + $0x240] sm:$0xff]  ;;  %v444_v60 = vld [vmem:[%s3288_s7 + $0x250] sm:$0xff] }
  0xd0   :  { %1900 = vmatpush3.bf16.msra.mxu0 %v1899_v15  ;;  %v1951_v15 = vpack.c.bf16 %v435_v4, %v434_v3  ;;  %v443_v54 = vld [vmem:[%s3288_s7 + $0x248] sm:$0xff]  ;;  %v445_v61 = vld [vmem:[%s3288_s7 + $0x258] sm:$0xff]  ;;  %v462_v62 = vld [vmem:[%s3288_s7 + $0x2e0] sm:$0xff] }
  0xd1   :  { %1902 = vmatprep.subr.bf16.mxu0 %v1901_v18  ;;  %v1935_v18 = vpack.c.bf16 %v411_v10, %v410_v9  ;;  %v1967_v57 = vpack.c.bf16 %v443_v54, %v442_v53  ;;  %v463_v63 = vld [vmem:[%s3288_s7 + $0x2e8] sm:$0xff]  ;;  %v446_v4 = vld [vmem:[%s3288_s7 + $0x260] sm:$0xff]  ;;  %v465_v7 = vld [vmem:[%s3288_s7 + $0x2f8] sm:$0xff] }
  0xd2   :  { %1884 = vmatpush1.bf16.msra.mxu1 %v1883_v14  ;;  %v160_v14 = vld [vmem:[#allocation7] sm:$0xff]  ;;  %v1973_v3 = vpack.c.bf16 %v463_v63, %v462_v62  ;;  %v448_v10 = vld [vmem:[%s3288_s7 + $0x270] sm:$0xff] }
  0xd3   :  { %1918 = vmatprep.subr.bf16.mxu1 %v1917_v20  ;;  %v454_v20 = vld [vmem:[%s3288_s7 + $0x2a0] sm:$0xff]  ;;  %v449_v11 = vld [vmem:[%s3288_s7 + $0x278] sm:$0xff] }
  0xd4   :  { %1904 = vmatpush3.bf16.msra.mxu0 %v1903_v27  ;;  %v165_v27 = vld [vmem:[#allocation7 + $0x28] sm:$0xff]  ;;  %v1957_v32 = vpack.c.bf16 %v455_v24, %v454_v20  ;;  %v1979_v12 = vpack.c.bf16 %v449_v11, %v448_v10  ;;  %v164_v13 = vld [vmem:[#allocation7 + $0x20] sm:$0xff]  ;;  %v699_v24 = vld [vmem:[#allocation14 + $0x20] sm:$0xff] }
  0xd5   :  { %359 = vmatmul.mubr.f32.vlgmr.msra.gmra.mrb[0].mxu1 %v158_v26  ;;  %1906 = vmatprep.subr.bf16.mxu0 %v1905_v31  ;;  %v431_v26 = vld [vmem:[%s3288_s7 + $0x1e8] sm:$0xff]  ;;  %v1939_v31 = vpack.c.bf16 %v413_v23, %v412_v22  ;;  %v696_v16 = vld [vmem:[#allocation14 + $0x8] sm:$0xff]  ;;  %v701_v20 = vld [vmem:[#allocation14 + $0x30] sm:$0xff] }
  0xd6   :  { %1920 = vmatpush3.bf16.msra.mxu1 %v1919_v30  ;;  %607 = vmatprep.mubr.f32.mxu1 %v163_v43  ;;  %v439_v30 = vld [vmem:[%s3288_s7 + $0x228] sm:$0xff]  ;;  %v1941_v34 = vpack.c.bf16 %v431_v26, %v430_v25  ;;  %v724_v54 = vld [vmem:[#allocation14 + $0xe8] sm:$0xff] }
  0xd7   :  { %1922 = vmatprep.subr.bf16.mxu1 %v1921_v33  ;;  %v456_v33 = vld [vmem:[%s3288_s7 + $0x2b0] sm:$0xff]  ;;  %v1959_v40 = vpack.c.bf16 %v439_v30, %v438_v29  ;;  %v706_v25 = vld [vmem:[#allocation14 + $0x58] sm:$0xff] }
  0xd8   :  { %1908 = vmatpush3.bf16.msra.mxu0 %v1907_v39  ;;  %v433_v39 = vld [vmem:[%s3288_s7 + $0x1f8] sm:$0xff]  ;;  %v1961_v43 = vpack.c.bf16 %v457_v37, %v456_v33  ;;  %v695_v23 = vld [vmem:[#allocation14] sm:$0xff]  ;;  %v714_v37 = vld [vmem:[#allocation14 + $0x98] sm:$0xff] }
  0xd9   :  { %1910 = vmatprep.subr.bf16.mxu0 %v1909_v44  ;;  %v441_v44 = vld [vmem:[%s3288_s7 + $0x238] sm:$0xff]  ;;  %v1945_v45 = vpack.c.bf16 %v433_v39, %v432_v38  ;;  %v1983_v26 = vpack.c.bf16 %v699_v24, %v695_v23  ;;  %v718_v38 = vld [vmem:[#allocation14 + $0xb8] sm:$0xff] }
  0xda   :  { %1924 = vmatpush3.bf16.msra.mxu1 %v1923_v42  ;;  %v1943_v42 = vpack.c.bf16 %v415_v36, %v414_v35  ;;  %v1963_v50 = vpack.c.bf16 %v441_v44, %v440_v41  ;;  %v708_v29 = vld [vmem:[#allocation14 + $0x68] sm:$0xff]  ;;  %v709_v33 = vld [vmem:[#allocation14 + $0x70] sm:$0xff]  ;;  %v707_v36 = vld [vmem:[#allocation14 + $0x60] sm:$0xff] }
  0xdb   :  { %1926 = vmatprep.subr.bf16.mxu1 %v1925_v46  ;;  %v416_v46 = vld [vmem:[%s3288_s7 + $0x170] sm:$0xff]  ;;  %v738_v10 = vld [vmem:[#allocation14 + $0x158] sm:$0xff] }
  0xdc   :  { %1912 = vmatpush3.bf16.msra.mxu0 %v1911_v52  ;;  %v1947_v51 = vpack.c.bf16 %v417_v47, %v416_v46  ;;  %v1965_v52 = vpack.c.bf16 %v459_v49, %v458_v48  ;;  %v712_v41 = vld [vmem:[#allocation14 + $0x88] sm:$0xff]  ;;  %v711_v46 = vld [vmem:[#allocation14 + $0x80] sm:$0xff]  ;;  %v722_v49 = vld [vmem:[#allocation14 + $0xd8] sm:$0xff] }
  0xdd   :  { %1914 = vmatprep.subr.bf16.mxu0 %v1913_v56  ;;  %v461_v56 = vld [vmem:[%s3288_s7 + $0x2d8] sm:$0xff]  ;;  %v715_v47 = vld [vmem:[#allocation14 + $0xa0] sm:$0xff]  ;;  %v742_v11 = vld [vmem:[#allocation14 + $0x178] sm:$0xff] }
  0xde   :  { %1928 = vmatpush3.bf16.msra.mxu1 %v1927_v55  ;;  %v460_v55 = vld [vmem:[%s3288_s7 + $0x2d0] sm:$0xff]  ;;  %v750_v23 = vld [vmem:[#allocation14 + $0x1b8] sm:$0xff] }
  0xdf   :  { %1930 = vmatprep.subr.bf16.mxu1 %v1929_v58  ;;  %v162_v58 = vld [vmem:[#allocation7 + $0x10] sm:$0xff]  ;;  %v1969_v59 = vpack.c.bf16 %v461_v56, %v460_v55  ;;  %v721_v55 = vld [vmem:[#allocation14 + $0xd0] sm:$0xff]  ;;  %v728_v62 = vld [vmem:[#allocation14 + $0x108] sm:$0xff] }
  0xe0   :  { %1916 = vmatpush3.bf16.msra.mxu0 %v1915_v2  ;;  %v1971_v2 = vpack.c.bf16 %v445_v61, %v444_v60  ;;  %v725_v56 = vld [vmem:[#allocation14 + $0xf0] sm:$0xff]  ;;  %v730_v60 = vld [vmem:[#allocation14 + $0x118] sm:$0xff]  ;;  %v732_v63 = vld [vmem:[#allocation14 + $0x128] sm:$0xff] }
  0xe1   :  { %1950 = vmatprep.subr.bf16.mxu0 %v1949_v6  ;;  %v464_v6 = vld [vmem:[%s3288_s7 + $0x2f0] sm:$0xff]  ;;  %v734_v61 = vld [vmem:[#allocation14 + $0x138] sm:$0xff] }
  0xe2   :  { %1932 = vmatpush3.bf16.msra.mxu1 %v1931_v5  ;;  %v447_v5 = vld [vmem:[%s3288_s7 + $0x268] sm:$0xff]  ;;  %v1977_v9 = vpack.c.bf16 %v465_v7, %v464_v6  ;;  %v733_v6 = vld [vmem:[#allocation14 + $0x130] sm:$0xff]  ;;  %v744_v24 = vld [vmem:[#allocation14 + $0x188] sm:$0xff]  ;;  %s2538_s7 = smov 64  }
  0xe3   :  { %1934 = vmatprep.subr.bf16.mxu1 %v1933_v8  ;;  %538 = vmatmul.mubr.f32.vlgmr.msra.gmra.mrb[2].mxu0 %v160_v14  ;;  %v1975_v8 = vpack.c.bf16 %v447_v5, %v446_v4  ;;  %v698_v14 = vld [vmem:[#allocation14 + $0x18] sm:$0xff]  ;;  %v2061_v4 = vpack.c.bf16 %v734_v61, %v730_v60  ;;  %v729_v5 = vld [vmem:[#allocation14 + $0x110] sm:$0xff]  ;;  %v727_v7 = vld [vmem:[#allocation14 + $0x100] sm:$0xff] }
  0xe4   :  { %1952 = vmatpush3.bf16.msra.mxu0 %v1951_v15  ;;  %677 = vmatprep.mubr.f32.mxu0 %v165_v27  ;;  %v702_v15 = vld [vmem:[#allocation14 + $0x38] sm:$0xff]  ;;  %v768_v60 = vld [vmem:[#allocation14 + $0x248] sm:$0xff] }
  0xe5   :  { %1954 = vmatprep.subr.bf16.mxu0 %v1953_v19  ;;  %v2045_v17 = vpack.c.bf16 %v702_v15, %v698_v14  ;;  %v697_v19 = vld [vmem:[#allocation14 + $0x10] sm:$0xff]  ;;  %v710_v27 = vld [vmem:[#allocation14 + $0x78] sm:$0xff]  ;;  %v2063_v14 = vpack.c.bf16 %v733_v6, %v729_v5  ;;  %v772_v61 = vld [vmem:[#allocation14 + $0x268] sm:$0xff] }
  0xe6   :  { %1936 = vmatpush3.bf16.msra.mxu1 %v1935_v18  ;;  %v700_v18 = vld [vmem:[#allocation14 + $0x28] sm:$0xff]  ;;  %v2047_v22 = vpack.c.bf16 %v701_v20, %v697_v19  ;;  %v2049_v30 = vpack.c.bf16 %v710_v27, %v706_v25  ;;  %v735_v19 = vld [vmem:[#allocation14 + $0x140] sm:$0xff]  ;;  %v2017_v6 = vpack.c.bf16 %v772_v61, %v768_v60 }
  0xe7   :  { %1938 = vmatprep.subr.bf16.mxu1 %v1937_v21  ;;  %v1981_v21 = vpack.c.bf16 %v700_v18, %v696_v16  ;;  %v2065_v16 = vpack.c.bf16 %v742_v11, %v738_v10  ;;  %v741_v18 = vld [vmem:[#allocation14 + $0x170] sm:$0xff]  ;;  %v748_v25 = vld [vmem:[#allocation14 + $0x1a8] sm:$0xff]  ;;  %v767_v5 = vld [vmem:[#allocation14 + $0x240] sm:$0xff] }
  0xe8   :  { %1956 = vmatpush3.bf16.msra.mxu0 %v1955_v28  ;;  %v704_v28 = vld [vmem:[#allocation14 + $0x48] sm:$0xff] }
  0xe9   :  { %1958 = vmatprep.subr.bf16.mxu0 %v1957_v32  ;;  %v705_v32 = vld [vmem:[#allocation14 + $0x50] sm:$0xff]  ;;  %v776_v10 = vld [vmem:[#allocation14 + $0x288] sm:$0xff] }
  0xea   :  { %1940 = vmatpush3.bf16.msra.mxu1 %v1939_v31  ;;  %v1985_v31 = vpack.c.bf16 %v708_v29, %v704_v28  ;;  %v2051_v35 = vpack.c.bf16 %v709_v33, %v705_v32  ;;  %v745_v29 = vld [vmem:[#allocation14 + $0x190] sm:$0xff]  ;;  %v2005_v32 = vpack.c.bf16 %v748_v25, %v744_v24  ;;  %v747_v33 = vld [vmem:[#allocation14 + $0x1a0] sm:$0xff]  ;;  %v780_v11 = vld [vmem:[#allocation14 + $0x2a8] sm:$0xff] }
  0xeb   :  { %1942 = vmatprep.subr.bf16.mxu1 %v1941_v34  ;;  %v703_v34 = vld [vmem:[#allocation14 + $0x40] sm:$0xff] }
  0xec   :  { %1960 = vmatpush3.bf16.msra.mxu0 %v1959_v40  ;;  %v1987_v39 = vpack.c.bf16 %v707_v36, %v703_v34  ;;  %v2053_v40 = vpack.c.bf16 %v718_v38, %v714_v37  ;;  %v754_v34 = vld [vmem:[#allocation14 + $0x1d8] sm:$0xff]  ;;  %v752_v36 = vld [vmem:[#allocation14 + $0x1c8] sm:$0xff] }
  0xed   :  { %1962 = vmatprep.subr.bf16.mxu0 %v1961_v43  ;;  %v713_v43 = vld [vmem:[#allocation14 + $0x90] sm:$0xff]  ;;  %v756_v37 = vld [vmem:[#allocation14 + $0x1e8] sm:$0xff] }
  0xee   :  { %1944 = vmatpush3.bf16.msra.mxu1 %v1943_v42  ;;  %v716_v42 = vld [vmem:[#allocation14 + $0xa8] sm:$0xff] }
  0xef   :  { %1946 = vmatprep.subr.bf16.mxu1 %v1945_v45  ;;  %v1989_v44 = vpack.c.bf16 %v716_v42, %v712_v41  ;;  %v717_v45 = vld [vmem:[#allocation14 + $0xb0] sm:$0xff] }
  0xf0   :  { %1964 = vmatpush3.bf16.msra.mxu0 %v1963_v50  ;;  %v2055_v48 = vpack.c.bf16 %v717_v45, %v713_v43  ;;  %v726_v50 = vld [vmem:[#allocation14 + $0xf8] sm:$0xff]  ;;  %v753_v41 = vld [vmem:[#allocation14 + $0x1d0] sm:$0xff]  ;;  %v751_v43 = vld [vmem:[#allocation14 + $0x1c0] sm:$0xff] }
  0xf1   :  { %1966 = vmatprep.subr.bf16.mxu0 %v1965_v52  ;;  %v1991_v52 = vpack.c.bf16 %v715_v47, %v711_v46  ;;  %v2057_v53 = vpack.c.bf16 %v726_v50, %v722_v49  ;;  %v757_v42 = vld [vmem:[#allocation14 + $0x1f0] sm:$0xff]  ;;  %v755_v45 = vld [vmem:[#allocation14 + $0x1e0] sm:$0xff]  ;;  %v762_v46 = vld [vmem:[#allocation14 + $0x218] sm:$0xff] }
  0xf2   :  { %1948 = vmatpush3.bf16.msra.mxu1 %v1947_v51  ;;  %v720_v51 = vld [vmem:[#allocation14 + $0xc8] sm:$0xff]  ;;  %v766_v47 = vld [vmem:[#allocation14 + $0x238] sm:$0xff]  ;;  %v2075_v50 = vpack.c.bf16 %v757_v42, %v753_v41  ;;  %v791_v41 = vld [vmem:[#allocation14 + $0x300] sm:$0xff] }
  0xf3   :  { %1982 = vmatprep.subr.bf16.mxu1 %v1981_v21  ;;  %v739_v21 = vld [vmem:[#allocation14 + $0x160] sm:$0xff]  ;;  %v764_v49 = vld [vmem:[#allocation14 + $0x228] sm:$0xff] }
  0xf4   :  { %1968 = vmatpush3.bf16.msra.mxu0 %v1967_v57  ;;  %v1993_v57 = vpack.c.bf16 %v724_v54, %v720_v51  ;;  %v2003_v27 = vpack.c.bf16 %v739_v21, %v735_v19  ;;  %v2011_v51 = vpack.c.bf16 %v755_v45, %v751_v43  ;;  %v765_v54 = vld [vmem:[#allocation14 + $0x230] sm:$0xff]  ;;  %v779_v19 = vld [vmem:[#allocation14 + $0x2a0] sm:$0xff]  ;;  %v790_v21 = vld [vmem:[#allocation14 + $0x2f8] sm:$0xff] }
  0xf5   :  { %608 = vmatmul.mubr.f32.vlgmr.msra.gmra.mrb[2].mxu1 %v162_v58  ;;  %1970 = vmatprep.subr.bf16.mxu0 %v1969_v59  ;;  %v719_v58 = vld [vmem:[#allocation14 + $0xc0] sm:$0xff]  ;;  %v806_v45 = vld [vmem:[#allocation14 + $0x378] sm:$0xff] }
  0xf6   :  { %1984 = vmatpush1.bf16.msra.mxu1 %v1983_v26  ;;  %v723_v59 = vld [vmem:[#allocation14 + $0xe0] sm:$0xff] }
  0xf7   :  { %1986 = vmatprep.subr.bf16.mxu1 %v1985_v31  ;;  %v743_v31 = vld [vmem:[#allocation14 + $0x180] sm:$0xff] }
  0xf8   :  { %1972 = vmatpush3.bf16.msra.mxu0 %v1971_v2  ;;  %v2059_v2 = vpack.c.bf16 %v725_v56, %v721_v55  ;;  %v759_v55 = vld [vmem:[#allocation14 + $0x200] sm:$0xff] }
  0xf9   :  { %1974 = vmatprep.subr.bf16.mxu0 %v1973_v3  ;;  %v1995_v3 = vpack.c.bf16 %v723_v59, %v719_v58  ;;  %v770_v58 = vld [vmem:[#allocation14 + $0x258] sm:$0xff]  ;;  %v795_v43 = vld [vmem:[#allocation14 + $0x320] sm:$0xff] }
  0xfa   :  { %1988 = vmatpush1.bf16.msra.mxu1 %v1987_v39  ;;  %v2007_v39 = vpack.c.bf16 %v747_v33, %v743_v31  ;;  %v774_v59 = vld [vmem:[#allocation14 + $0x278] sm:$0xff]  ;;  %v787_v31 = vld [vmem:[#allocation14 + $0x2e0] sm:$0xff] }
  0xfb   :  { %1990 = vmatprep.subr.bf16.mxu1 %v1989_v44  ;;  %v2009_v44 = vpack.c.bf16 %v756_v37, %v752_v36  ;;  %v798_v33 = vld [vmem:[#allocation14 + $0x338] sm:$0xff] }
  0xfc   :  { %1976 = vmatpush3.bf16.msra.mxu0 %v1975_v8  ;;  %v1997_v8 = vpack.c.bf16 %v732_v63, %v728_v62 }
  0xfd   :  { %1978 = vmatprep.subr.bf16.mxu0 %v1977_v9  ;;  %v731_v9 = vld [vmem:[#allocation14 + $0x120] sm:$0xff] }
  0xfe   :  { %1992 = vmatpush1.bf16.msra.mxu1 %v1991_v52  ;;  %v1999_v15 = vpack.c.bf16 %v731_v9, %v727_v7  ;;  %v2077_v52 = vpack.c.bf16 %v766_v47, %v762_v46  ;;  %v771_v7 = vld [vmem:[#allocation14 + $0x260] sm:$0xff]  ;;  %v782_v9 = vld [vmem:[#allocation14 + $0x2b8] sm:$0xff]  ;;  %v800_v46 = vld [vmem:[#allocation14 + $0x348] sm:$0xff] }
  0xff   :  { %1994 = vmatprep.subr.bf16.mxu1 %v1993_v57  ;;  %v763_v57 = vld [vmem:[#allocation14 + $0x220] sm:$0xff]  ;;  %v804_v47 = vld [vmem:[#allocation14 + $0x368] sm:$0xff] }
 0x100   :  { %1980 = vmatpush3.bf16.msra.mxu0 %v1979_v12  ;;  %v736_v12 = vld [vmem:[#allocation14 + $0x148] sm:$0xff]  ;;  %v2015_v63 = vpack.c.bf16 %v763_v57, %v759_v55  ;;  %v803_v55 = vld [vmem:[#allocation14 + $0x360] sm:$0xff]  ;;  %v814_v57 = vld [vmem:[#allocation14 + $0x3b8] sm:$0xff] }
 0x101   :  { %2046 = vmatprep.subr.bf16.mxu0 %v2045_v17  ;;  %v737_v17 = vld [vmem:[#allocation14 + $0x150] sm:$0xff] }
 0x102   :  { %1996 = vmatpush1.bf16.msra.mxu1 %v1995_v3  ;;  %v2067_v26 = vpack.c.bf16 %v741_v18, %v737_v17  ;;  %v769_v3 = vld [vmem:[#allocation14 + $0x250] sm:$0xff]  ;;  %v775_v17 = vld [vmem:[#allocation14 + $0x280] sm:$0xff]  ;;  %v2021_v18 = vpack.c.bf16 %v780_v11, %v776_v10  ;;  %v816_v10 = vld [vmem:[#allocation14 + $0x3c8] sm:$0xff] }
 0x103   :  { %678 = vmatmul.mubr.f32.vlgmr.msra.gmra.mrb[4].mxu0 %v164_v13  ;;  %v740_v13 = vld [vmem:[#allocation14 + $0x168] sm:$0xff]  ;;  %1998 = vmatprep.subr.bf16.mxu1 %v1997_v8  ;;  %v778_v8 = vld [vmem:[#allocation14 + $0x298] sm:$0xff]  ;;  %v2023_v25 = vpack.c.bf16 %v779_v19, %v775_v17  ;;  %v819_v19 = vld [vmem:[#allocation14 + $0x3e0] sm:$0xff] }
 0x104   :  { %2048 = vmatpush1.bf16.msra.mxu0 %v2047_v22  ;;  %v2001_v20 = vpack.c.bf16 %v740_v13, %v736_v12  ;;  %v746_v22 = vld [vmem:[#allocation14 + $0x198] sm:$0xff]  ;;  %v2019_v13 = vpack.c.bf16 %v771_v7, %v767_v5  ;;  %v820_v11 = vld [vmem:[#allocation14 + $0x3e8] sm:$0xff] }
 0x105   :  { %2050 = vmatprep.subr.bf16.mxu0 %v2049_v30  ;;  %v2069_v28 = vpack.c.bf16 %v750_v23, %v746_v22  ;;  %v749_v30 = vld [vmem:[#allocation14 + $0x1b0] sm:$0xff]  ;;  %v784_v22 = vld [vmem:[#allocation14 + $0x2c8] sm:$0xff]  ;;  %v818_v7 = vld [vmem:[#allocation14 + $0x3d8] sm:$0xff]  ;;  %v2041_v17 = vpack.c.bf16 %v820_v11, %v816_v10 }
 0x106   :  { %2000 = vmatpush1.bf16.msra.mxu1 %v1999_v15  ;;  %v2071_v38 = vpack.c.bf16 %v749_v30, %v745_v29  ;;  %v777_v15 = vld [vmem:[#allocation14 + $0x290] sm:$0xff]  ;;  %v788_v23 = vld [vmem:[#allocation14 + $0x2e8] sm:$0xff]  ;;  %v783_v29 = vld [vmem:[#allocation14 + $0x2c0] sm:$0xff] }
 0x107   :  { %2002 = vmatprep.subr.bf16.mxu1 %v2001_v20  ;;  %v786_v20 = vld [vmem:[#allocation14 + $0x2d8] sm:$0xff]  ;;  %v2025_v30 = vpack.c.bf16 %v788_v23, %v784_v22  ;;  %v2027_v37 = vpack.c.bf16 %v787_v31, %v783_v29 }
 0x108   :  { %2052 = vmatpush1.bf16.msra.mxu0 %v2051_v35  ;;  %v758_v35 = vld [vmem:[#allocation14 + $0x1f8] sm:$0xff] }
 0x109   :  { %2054 = vmatprep.subr.bf16.mxu0 %v2053_v40  ;;  %v2073_v40 = vpack.c.bf16 %v758_v35, %v754_v34  ;;  %v792_v34 = vld [vmem:[#allocation14 + $0x308] sm:$0xff]  ;;  %v1549_v22 = vld [vmem:[#allocation8] ss:$0 sm:$0xff]  ;;  %v995_v10 = vld [vmem:[%s3290_s9 + $0x20] sm:$0xff] }
 0x10a   :  { %2004 = vmatpush1.bf16.msra.mxu1 %v2003_v27  ;;  %v785_v27 = vld [vmem:[#allocation14 + $0x2d0] sm:$0xff]  ;;  %v796_v35 = vld [vmem:[#allocation14 + $0x328] sm:$0xff]  ;;  %v996_v11 = vld [vmem:[%s3290_s9 + $0x28] sm:$0xff] }
 0x10b   :  { %2006 = vmatprep.subr.bf16.mxu1 %v2005_v32  ;;  %v794_v32 = vld [vmem:[#allocation14 + $0x318] sm:$0xff]  ;;  %v2029_v42 = vpack.c.bf16 %v796_v35, %v792_v34 }
 0x10c   :  { %2056 = vmatpush1.bf16.msra.mxu0 %v2055_v48  ;;  %v760_v48 = vld [vmem:[#allocation14 + $0x208] sm:$0xff]  ;;  %v1552_v34 = vld [vmem:[#allocation10] ss:$0 sm:$0xff] }
 0x10d   :  { %2058 = vmatprep.subr.bf16.mxu0 %v2057_v53  ;;  %v761_v53 = vld [vmem:[#allocation14 + $0x210] sm:$0xff]  ;;  %v2013_v56 = vpack.c.bf16 %v764_v49, %v760_v48  ;;  %v2031_v49 = vpack.c.bf16 %v795_v43, %v791_v41 }
 0x10e   :  { %2008 = vmatpush1.bf16.msra.mxu1 %v2007_v39  ;;  %v2079_v62 = vpack.c.bf16 %v765_v54, %v761_v53  ;;  %v793_v39 = vld [vmem:[#allocation14 + $0x310] sm:$0xff]  ;;  %v799_v53 = vld [vmem:[#allocation14 + $0x340] sm:$0xff]  ;;  %v2033_v54 = vpack.c.bf16 %v804_v47, %v800_v46 }
 0x10f   :  { %2010 = vmatprep.subr.bf16.mxu1 %v2009_v44  ;;  %v802_v44 = vld [vmem:[#allocation14 + $0x358] sm:$0xff]  ;;  %v2035_v61 = vpack.c.bf16 %v803_v55, %v799_v53 }
 0x110   :  { %2060 = vmatpush1.bf16.msra.mxu0 %v2059_v2  ;;  %v2081_v2 = vpack.c.bf16 %v774_v59, %v770_v58  ;;  %v808_v58 = vld [vmem:[#allocation14 + $0x388] sm:$0xff] }
 0x111   :  { %2062 = vmatprep.subr.bf16.mxu0 %v2061_v4  ;;  %v773_v4 = vld [vmem:[#allocation14 + $0x270] sm:$0xff]  ;;  %v812_v59 = vld [vmem:[#allocation14 + $0x3a8] sm:$0xff] }
 0x112   :  { %2012 = vmatpush1.bf16.msra.mxu1 %v2011_v51  ;;  %v2083_v12 = vpack.c.bf16 %v773_v4, %v769_v3  ;;  %v801_v51 = vld [vmem:[#allocation14 + $0x350] sm:$0xff]  ;;  %v807_v3 = vld [vmem:[#allocation14 + $0x380] sm:$0xff]  ;;  %v2037_v5 = vpack.c.bf16 %v812_v59, %v808_v58 }
 0x113   :  { %2014 = vmatprep.subr.bf16.mxu1 %v2013_v56  ;;  %v810_v56 = vld [vmem:[#allocation14 + $0x398] sm:$0xff] }
 0x114   :  { %2064 = vmatpush1.bf16.msra.mxu0 %v2063_v14  ;;  %v2085_v14 = vpack.c.bf16 %v782_v9, %v778_v8  ;;  %v822_v8 = vld [vmem:[#allocation14 + $0x3f8] sm:$0xff] }
 0x115   :  { %2066 = vmatprep.subr.bf16.mxu0 %v2065_v16  ;;  %v781_v16 = vld [vmem:[#allocation14 + $0x2b0] sm:$0xff]  ;;  %v992_v58 = vld [vmem:[%s3290_s9 + $0x8] sm:$0xff] }
 0x116   :  { %2016 = vmatpush1.bf16.msra.mxu1 %v2015_v63  ;;  %v2087_v24 = vpack.c.bf16 %v781_v16, %v777_v15  ;;  %v809_v63 = vld [vmem:[#allocation14 + $0x390] sm:$0xff] }
 0x117   :  { %2018 = vmatprep.subr.bf16.mxu1 %v2017_v6  ;;  %v811_v6 = vld [vmem:[#allocation14 + $0x3a0] sm:$0xff]  ;;  %v817_v15 = vld [vmem:[#allocation14 + $0x3d0] sm:$0xff] }
 0x118   :  { %2068 = vmatpush1.bf16.msra.mxu0 %v2067_v26  ;;  %v2089_v26 = vpack.c.bf16 %v790_v21, %v786_v20  ;;  %v821_v16 = vld [vmem:[#allocation14 + $0x3f0] sm:$0xff] }
 0x119   :  { %2070 = vmatprep.subr.bf16.mxu0 %v2069_v28  ;;  %v789_v28 = vld [vmem:[#allocation14 + $0x2f0] sm:$0xff]  ;;  %v2107_v20 = vpack.c.bf16 %v821_v16, %v817_v15  ;;  %v2116_v15 = vpack.c.bf16 %v996_v11, %v995_v10  ;;  %v1214_v10 = vld [vmem:[#allocation13 + $0xd8] sm:$0xff]  ;;  %v1235_v11 = vld [vmem:[#allocation13 + $0x180] sm:$0xff] }
 0x11a   :  { %2020 = vmatpush1.bf16.msra.mxu1 %v2019_v13  ;;  %v2091_v36 = vpack.c.bf16 %v789_v28, %v785_v27  ;;  %v2039_v13 = vpack.c.bf16 %v811_v6, %v807_v3  ;;  %v993_v3 = vld [vmem:[%s3290_s9 + $0x10] sm:$0xff]  ;;  %v1091_v16 = vld [vmem:[%s3292_s11 + $0x38] sm:$0xff] }
 0x11b   :  { %2022 = vmatprep.subr.bf16.mxu1 %v2021_v18  ;;  %v815_v18 = vld [vmem:[#allocation14 + $0x3c0] sm:$0xff] }
 0x11c   :  { %2072 = vmatpush1.bf16.msra.mxu0 %v2071_v38  ;;  %v2093_v38 = vpack.c.bf16 %v798_v33, %v794_v32  ;;  %v2043_v21 = vpack.c.bf16 %v819_v19, %v815_v18  ;;  %v1092_v19 = vld [vmem:[%s3292_s11 + $0x40] sm:$0xff] }
 0x11d   :  { %2074 = vmatprep.subr.bf16.mxu0 %v2073_v40  ;;  %v797_v40 = vld [vmem:[#allocation14 + $0x330] sm:$0xff] }
 0x11e   :  { %2024 = vmatpush1.bf16.msra.mxu1 %v2023_v25  ;;  %v2095_v48 = vpack.c.bf16 %v797_v40, %v793_v39 }
 0x11f   :  { %2026 = vmatprep.subr.bf16.mxu1 %v2025_v30 }
 0x120   :  { %2076 = vmatpush1.bf16.msra.mxu0 %v2075_v50  ;;  %v2097_v50 = vpack.c.bf16 %v806_v45, %v802_v44 }
 0x121   :  { %2078 = vmatprep.subr.bf16.mxu0 %v2077_v52  ;;  %v805_v52 = vld [vmem:[#allocation14 + $0x370] sm:$0xff] }
 0x122   :  { %2028 = vmatpush1.bf16.msra.mxu1 %v2027_v37  ;;  %v2099_v60 = vpack.c.bf16 %v805_v52, %v801_v51 }
 0x123   :  { %2030 = vmatprep.subr.bf16.mxu1 %v2029_v42 }
 0x124   :  { %2080 = vmatpush1.bf16.msra.mxu0 %v2079_v62  ;;  %v2101_v62 = vpack.c.bf16 %v814_v57, %v810_v56  ;;  %v1085_v56 = vld [vmem:[%s3292_s11 + $0x8] sm:$0xff]  ;;  %v991_v57 = vld [vmem:[%s3290_s9] sm:$0xff] }
 0x125   :  { %2082 = vmatprep.subr.bf16.mxu0 %v2081_v2  ;;  %v813_v2 = vld [vmem:[#allocation14 + $0x3b0] sm:$0xff] }
 0x126   :  { %2032 = vmatpush1.bf16.msra.mxu1 %v2031_v49  ;;  %v1546_v49 = vld [vmem:[%s3285_s4] ss:$0 sm:$0xff] }
 0x127   :  { %2034 = vmatprep.subr.bf16.mxu1 %v2033_v54  ;;  %v1084_v54 = vld [vmem:[%s3292_s11] sm:$0xff] }
 0x128   :  { %2084 = vmatpush1.bf16.msra.mxu0 %v2083_v12  ;;  %v2103_v12 = vpack.c.bf16 %v813_v2, %v809_v63  ;;  %v2125_v59 = vpack.c.bf16 %v1085_v56, %v1084_v54  ;;  %v1087_v2 = vld [vmem:[%s3292_s11 + $0x18] sm:$0xff]  ;;  %v2282_v54 = vld [vmem:[#allocation7 + $0x8] sm:$0xff] }
 0x129   :  { %2086 = vmatprep.subr.bf16.mxu0 %v2085_v14  ;;  %v2105_v14 = vpack.c.bf16 %v822_v8, %v818_v7  ;;  %v1088_v7 = vld [vmem:[%s3292_s11 + $0x20] sm:$0xff] }
 0x12a   :  { %2036 = vmatpush1.bf16.msra.mxu1 %v2035_v61  ;;  %v2110_v61 = vpack.c.bf16 %v992_v58, %v991_v57  ;;  %v1100_v56 = vld [vmem:[%s3292_s11 + $0x80] sm:$0xff]  ;;  %v1101_v58 = vld [vmem:[%s3292_s11 + $0x88] sm:$0xff] }
 0x12b   :  { %2038 = vmatprep.subr.bf16.mxu1 %v2037_v5 }
 0x12c   :  { %2088 = vmatpush1.bf16.msra.mxu0 %v2087_v24 }
 0x12d   :  { %2090 = vmatprep.subr.bf16.mxu0 %v2089_v26 }
 0x12e   :  { %2040 = vmatpush1.bf16.msra.mxu1 %v2039_v13 }
 0x12f   :  { %2042 = vmatprep.subr.bf16.mxu1 %v2041_v17  ;;  %v998_v17 = vld [vmem:[%s3290_s9 + $0x38] sm:$0xff] }
 0x130   :  { %2092 = vmatpush1.bf16.msra.mxu0 %v2091_v36 }
 0x131   :  { %2094 = vmatprep.subr.bf16.mxu0 %v2093_v38 }
 0x132   :  { %2044 = vmatpush1.bf16.msra.mxu1 %v2043_v21  ;;  %v1093_v21 = vld [vmem:[%s3292_s11 + $0x48] sm:$0xff] }
 0x133   :  { %2109 = vmatprep.subr.bf16.mxu1 %v2535_v0 }
 0x134   :  { %2096 = vmatpush1.bf16.msra.mxu0 %v2095_v48 }
 0x135   :  { %2098 = vmatprep.subr.bf16.mxu0 %v2097_v50 }
 0x138   :  { %2100 = vmatpush1.bf16.msra.mxu0 %v2099_v60  ;;  %v1086_v60 = vld [vmem:[%s3292_s11 + $0x10] sm:$0xff] }
 0x139   :  { %2102 = vmatprep.subr.bf16.mxu0 %v2101_v62  ;;  %v2128_v6 = vpack.c.bf16 %v1087_v2, %v1086_v60  ;;  %v1193_v60 = vld [vmem:[#allocation13 + $0x30] sm:$0xff]  ;;  %v2149_v2 = vpack.c.bf16 %v1101_v58, %v1100_v56  ;;  %v1270_v58 = vld [vmem:[#allocation13 + $0x298] sm:$0xff] }
 0x13a   :  { %v1225_v56 = vld [vmem:[#allocation13 + $0x130] sm:$0xff] }
 0x13c   :  { %2104 = vmatpush1.bf16.msra.mxu0 %v2103_v12  ;;  %v2280_v12 = vld [vmem:[#allocation5 + $0x8] sm:$0xff] }
 0x13d   :  { %2106 = vmatprep.subr.bf16.mxu0 %v2105_v14  ;;  %v1090_v14 = vld [vmem:[%s3292_s11 + $0x30] sm:$0xff] }
 0x13e   :  { %v2134_v18 = vpack.c.bf16 %v1091_v16, %v1090_v14  ;;  %v1198_v16 = vld [vmem:[#allocation13 + $0x58] sm:$0xff] }
 0x140   :  { %2108 = vmatpush1.bf16.msra.mxu0 %v2107_v20 }
 0x141   :  { %2124 = vmatprep.subr.bf16.mxu0 %v2535_v0 }
 0x196   :  { %v3129_v4 = vpop.f32.mrb[0].mxu0 }
 0x197   :  { %v1816_v9 = vpop.f32.mrb[1].mxu0  ;;  %v254_v50 = vadd.f32 %v1546_v49, %v3129_v4  ;;  %v994_v4 = vld [vmem:[%s3290_s9 + $0x18] sm:$0xff] }
 0x198   :  { %v2113_v8 = vpack.c.bf16 %v994_v4, %v993_v3  ;;  %v1089_v9 = vld [vmem:[%s3292_s11 + $0x28] sm:$0xff]  ;;  %v1102_v3 = vld [vmem:[%s3292_s11 + $0x90] sm:$0xff]  ;;  %v1103_v4 = vld [vmem:[%s3292_s11 + $0x98] sm:$0xff] }
 0x199   :  { %v258_v51 = vmin.f32 %v254_v50, 0.0  ;;  %vm257_vm5 = vcmp.gt.f32.partialorder %v254_v50, 0.0  ;;  %v2131_v13 = vpack.c.bf16 %v1089_v9, %v1088_v7  ;;  %v1195_v7 = vld [vmem:[#allocation13 + $0x40] sm:$0xff]  ;;  %v1213_v9 = vld [vmem:[#allocation13 + $0xd0] sm:$0xff] }
 0x19b   :  { %v259_v52 = vmul.f32 1.442695, %v258_v51  ;;  %v1192_v51 = vld [vmem:[#allocation13 + $0x28] sm:$0xff] }
 0x1a8   :  { %v360_v23 = vpop.f32.mrb[0].mxu1 }
 0x1a9   :  { %v361_v24 = vadd.f32 %v1549_v22, %v360_v23  ;;  %v362_v25 = vpop.f32.mrb[1].mxu1  ;;  %v999_v22 = vld [vmem:[%s3290_s9 + $0x40] sm:$0xff]  ;;  %v1000_v23 = vld [vmem:[%s3290_s9 + $0x48] sm:$0xff] }
 0x1aa   :  { %v1204_v25 = vld [vmem:[#allocation13 + $0x88] sm:$0xff] }
 0x1ab   :  { %v365_v26 = vmin.f32 %v361_v24, 0.0  ;;  %vm364_vm3 = vcmp.gt.f32.partialorder %v361_v24, 0.0 }
 0x1ad   :  { %v366_v27 = vmul.f32 1.442695, %v365_v26  ;;  %v2137_v26 = vpack.c.bf16 %v1093_v21, %v1092_v19  ;;  %v1219_v19 = vld [vmem:[#allocation13 + $0x100] sm:$0xff]  ;;  %v1216_v21 = vld [vmem:[#allocation13 + $0xe8] sm:$0xff] }
 0x1af   :  { %2268 = vpow2.f32 %v366_v27  ;;  %v1094_v27 = vld [vmem:[%s3292_s11 + $0x50] sm:$0xff] }
 0x1b6   :  { %v1605_v28 = vpop.f32.mrb[2].mxu0 }
 0x1b7   :  { %v1606_v30 = vpop.f32.mrb[3].mxu0 }
 0x1b8   :  { %v1607_v32 = vadd.f32 %v1606_v30, %v1605_v28  ;;  %v2122_v28 = vpack.c.bf16 %v1000_v23, %v999_v22  ;;  %v1237_v22 = vld [vmem:[#allocation13 + $0x190] sm:$0xff]  ;;  %v1238_v23 = vld [vmem:[#allocation13 + $0x198] sm:$0xff] }
 0x1b9   :  { %v2269_v29 = vpop.eup %2268 }
 0x1ba   :  { %v1551_v31 = vadd.f32 -1.0, %v2269_v29  ;;  %v540_v35 = vadd.f32 %v1607_v32, %v1552_v34  ;;  %v1095_v29 = vld [vmem:[%s3292_s11 + $0x58] sm:$0xff]  ;;  %v1206_v34 = vld [vmem:[#allocation13 + $0x98] sm:$0xff] }
 0x1bb   :  { %v1188_v32 = vld [vmem:[#allocation13 + $0x8] sm:$0xff] }
 0x1bc   :  { %v369_v33 = vsel %vm364_vm3, %v361_v24, %v1551_v31  ;;  %v1203_v24 = vld [vmem:[#allocation13 + $0x80] sm:$0xff] }
 0x1bd   :  { %690 = vrot.lane.b32.xlu0 %v369_v33, %s2538_s7  ;;  %v2154_v30 = vpack.c.bf16 %v1204_v25, %v1203_v24  ;;  %v1187_v31 = vld [vmem:[#allocation13] sm:$0xff]  ;;  %v1205_v33 = vld [vmem:[#allocation13 + $0x90] sm:$0xff] }
 0x1be   :  { %v1199_v25 = vld [vmem:[#allocation13 + $0x60] sm:$0xff] }
 0x1c8   :  { %v1640_v36 = vpop.f32.mrb[2].mxu1 }
 0x1c9   :  { %v1641_v37 = vpop.f32.mrb[3].mxu1 }
 0x1ca   :  { %v1642_v38 = vadd.f32 %v1641_v37, %v1640_v36  ;;  %v1096_v36 = vld [vmem:[%s3292_s11 + $0x60] sm:$0xff]  ;;  %v2156_v37 = vpack.c.bf16 %v1188_v32, %v1187_v31 }
 0x1cb   :  { %v1222_v31 = vld [vmem:[#allocation13 + $0x118] sm:$0xff] }
 0x1cc   :  { %v610_v39 = vadd.f32 %v1642_v38, %v540_v35  ;;  %v2140_v35 = vpack.c.bf16 %v1095_v29, %v1094_v27  ;;  %v1097_v38 = vld [vmem:[%s3292_s11 + $0x68] sm:$0xff]  ;;  %v1217_v29 = vld [vmem:[#allocation13 + $0xf0] sm:$0xff] }
 0x1cd   :  { %v1218_v32 = vld [vmem:[#allocation13 + $0xf8] sm:$0xff] }
 0x1d6   :  { %v1675_v40 = vpop.f32.mrb[4].mxu0 }
 0x1d7   :  { %v1676_v41 = vpop.f32.mrb[5].mxu0 }
 0x1d8   :  { %v1677_v42 = vadd.f32 %v1676_v41, %v1675_v40  ;;  %v1189_v40 = vld [vmem:[#allocation13 + $0x10] sm:$0xff]  ;;  %v1190_v41 = vld [vmem:[#allocation13 + $0x18] sm:$0xff] }
 0x1da   :  { %v680_v43 = vadd.f32 %v1677_v42, %v610_v39  ;;  %v2158_v39 = vpack.c.bf16 %v1206_v34, %v1205_v33  ;;  %v1207_v42 = vld [vmem:[#allocation13 + $0xa0] sm:$0xff]  ;;  %v1240_v34 = vld [vmem:[#allocation13 + $0x1a8] sm:$0xff] }
 0x1db   :  { %v1239_v33 = vld [vmem:[#allocation13 + $0x1a0] sm:$0xff] }
 0x1dc   :  { %v684_v44 = vmin.f32 %v680_v43, 0.0  ;;  %vm683_vm4 = vcmp.gt.f32.partialorder %v680_v43, 0.0 }
 0x1de   :  { %v685_v45 = vmul.f32 1.442695, %v684_v44  ;;  %v2281_v44 = vld [vmem:[#allocation2] sm:$0xff] }
 0x1e0   :  { %2270 = vpow2.f32 %v685_v45  ;;  %v2143_v45 = vpack.c.bf16 %v1097_v38, %v1096_v36  ;;  %v1202_v38 = vld [vmem:[#allocation13 + $0x78] sm:$0xff] }
 0x1e1   :  { %2272 = vpow2.f32 %v259_v52  ;;  %v1209_v52 = vld [vmem:[#allocation13 + $0xb0] sm:$0xff] }
 0x1ea   :  { %v2271_v46 = vpop.eup %2270 }
 0x1eb   :  { %v1553_v47 = vadd.f32 -1.0, %v2271_v46  ;;  %v2273_v53 = vpop.eup %2272  ;;  %v1098_v46 = vld [vmem:[%s3292_s11 + $0x70] sm:$0xff] }
 0x1ec   :  { %v1548_v55 = vadd.f32 -1.0, %v2273_v53  ;;  %v1210_v53 = vld [vmem:[#allocation13 + $0xb8] sm:$0xff] }
 0x1ed   :  { %v688_v48 = vsel %vm683_vm4, %v680_v43, %v1553_v47  ;;  %v1208_v43 = vld [vmem:[#allocation13 + $0xa8] sm:$0xff]  ;;  %v2160_v47 = vpack.c.bf16 %v1190_v41, %v1189_v40  ;;  %v2182_v40 = vpack.c.bf16 %v1218_v32, %v1217_v29  ;;  %v1267_v41 = vld [vmem:[#allocation13 + $0x280] sm:$0xff] }
 0x1ee   :  { %909 = vmatprep.mubr.f32.mxu1 %v688_v48  ;;  %980 = vmatprep.mubr.f32.mxu0 %v688_v48  ;;  %v262_v63 = vsel %vm257_vm5, %v254_v50, %v1548_v55  ;;  %v1099_v48 = vld [vmem:[%s3292_s11 + $0x78] sm:$0xff]  ;;  %v2162_v49 = vpack.c.bf16 %v1208_v43, %v1207_v42  ;;  %v1191_v50 = vld [vmem:[#allocation13 + $0x20] sm:$0xff]  ;;  %v2194_v42 = vpack.c.bf16 %v1240_v34, %v1239_v33  ;;  %v1250_v34 = vld [vmem:[#allocation13 + $0x1f8] sm:$0xff] }
 0x1ef   :  { %v2146_v55 = vpack.c.bf16 %v1099_v48, %v1098_v46  ;;  %v2164_v57 = vpack.c.bf16 %v1192_v51, %v1191_v50  ;;  %v1223_v43 = vld [vmem:[#allocation13 + $0x120] sm:$0xff]  ;;  %v1241_v46 = vld [vmem:[#allocation13 + $0x1b0] sm:$0xff]  ;;  %v1252_v51 = vld [vmem:[#allocation13 + $0x208] sm:$0xff] }
 0x1f0   :  { %v2284_v48 = vld [vmem:[#allocation7 + $0x18] sm:$0xff]  ;;  %v1249_v33 = vld [vmem:[#allocation13 + $0x1f0] sm:$0xff] }
 0x1f1   :  { %v1251_v50 = vld [vmem:[#allocation13 + $0x200] sm:$0xff]  ;;  %v1276_v32 = vld [vmem:[#allocation13 + $0x2c8] sm:$0xff] }
 0x1f2   :  { %v1275_v29 = vld [vmem:[#allocation13 + $0x2c0] sm:$0xff] }
 0x22f   :  { %v691_v62 = vpop.permute.xlu0 %690 }
 0x230   :  { %v694_v5 = vsel %vm693_vm6, %v262_v63, %v691_v62  ;;  %v1211_v62 = vld [vmem:[#allocation13 + $0xc0] sm:$0xff]  ;;  %v1212_v63 = vld [vmem:[#allocation13 + $0xc8] sm:$0xff] }
 0x231   :  { %910 = vmatmul.mubr.f32.vlgmr.msra.gmra.mrb[4].mxu1 %v694_v5  ;;  %981 = vmatmul.mubr.f32.vlgmr.msra.gmra.mrb[6].mxu0 %v694_v5 }
 0x232   :  { %2126 = vmatpush1.bf16.msra.mxu0 %v2125_v59  ;;  %2111 = vmatpush3.bf16.msra.mxu1 %v2110_v61  ;;  %v2166_v59 = vpack.c.bf16 %v1210_v53, %v1209_v52  ;;  %v1194_v61 = vld [vmem:[#allocation13 + $0x38] sm:$0xff] }
 0x233   :  { %2127 = vmatprep.subr.bf16.mxu0 %v2535_v0  ;;  %2112 = vmatprep.subr.bf16.mxu1 %v2535_v0  ;;  %v2168_v5 = vpack.c.bf16 %v1194_v61, %v1193_v60  ;;  %v1244_v60 = vld [vmem:[#allocation13 + $0x1c8] sm:$0xff]  ;;  %v2220_v61 = vpack.c.bf16 %v1252_v51, %v1251_v50  ;;  %v1279_v50 = vld [vmem:[#allocation13 + $0x2e0] sm:$0xff] }
 0x234   :  { %1558 = vmatprep.mubr.msk.f32.mxu0 %vm290_vm1, %v2280_v12  ;;  %1837 = vmatprep.mubr.msk.f32.mxu1 %vm2536_vm0, %v2537_v1  ;;  %v997_v1 = vld [vmem:[%s3290_s9 + $0x30] sm:$0xff] }
 0x235   :  { %v2119_v20 = vpack.c.bf16 %v998_v17, %v997_v1  ;;  %v1236_v12 = vld [vmem:[#allocation13 + $0x188] sm:$0xff]  ;;  %v2174_v1 = vpack.c.bf16 %v1214_v10, %v1213_v9  ;;  %v1215_v17 = vld [vmem:[#allocation13 + $0xe0] sm:$0xff]  ;;  %v1245_v9 = vld [vmem:[#allocation13 + $0x1d0] sm:$0xff] }
 0x236   :  { %2129 = vmatpush1.bf16.msra.mxu0 %v2128_v6  ;;  %2114 = vmatpush3.bf16.msra.mxu1 %v2113_v8  ;;  %v2170_v6 = vpack.c.bf16 %v1212_v63, %v1211_v62  ;;  %v1196_v8 = vld [vmem:[#allocation13 + $0x48] sm:$0xff]  ;;  %v1253_v62 = vld [vmem:[#allocation13 + $0x210] sm:$0xff]  ;;  %v1254_v63 = vld [vmem:[#allocation13 + $0x218] sm:$0xff] }
 0x237   :  { %2130 = vmatprep.subr.bf16.mxu0 %v2535_v0  ;;  %2115 = vmatprep.subr.bf16.mxu1 %v2535_v0  ;;  %v2172_v14 = vpack.c.bf16 %v1196_v8, %v1195_v7  ;;  %v1228_v7 = vld [vmem:[#allocation13 + $0x148] sm:$0xff]  ;;  %v1246_v10 = vld [vmem:[#allocation13 + $0x1d8] sm:$0xff] }
 0x238   :  { %v1272_v8 = vld [vmem:[#allocation13 + $0x2a8] sm:$0xff] }
 0x239   :  { %v1280_v51 = vld [vmem:[#allocation13 + $0x2e8] sm:$0xff] }
 0x23a   :  { %2132 = vmatpush1.bf16.msra.mxu0 %v2131_v13  ;;  %2117 = vmatpush3.bf16.msra.mxu1 %v2116_v15  ;;  %v2152_v13 = vpack.c.bf16 %v1103_v4, %v1102_v3  ;;  %v1197_v15 = vld [vmem:[#allocation13 + $0x50] sm:$0xff]  ;;  %v1271_v4 = vld [vmem:[#allocation13 + $0x2a0] sm:$0xff] }
 0x23b   :  { %2133 = vmatprep.subr.bf16.mxu0 %v2535_v0  ;;  %2118 = vmatprep.subr.bf16.mxu1 %v2535_v0  ;;  %v2176_v24 = vpack.c.bf16 %v1198_v16, %v1197_v15  ;;  %v2226_v16 = vpack.c.bf16 %v1272_v8, %v1271_v4 }
 0x23e   :  { %2135 = vmatpush1.bf16.msra.mxu0 %v2134_v18  ;;  %2120 = vmatpush3.bf16.msra.mxu1 %v2119_v20  ;;  %v2186_v18 = vpack.c.bf16 %v1236_v12, %v1235_v11  ;;  %v1220_v20 = vld [vmem:[#allocation13 + $0x108] sm:$0xff]  ;;  %v2224_v12 = vpack.c.bf16 %v1254_v63, %v1253_v62  ;;  %v1266_v62 = vld [vmem:[#allocation13 + $0x278] sm:$0xff] }
 0x23f   :  { %2136 = vmatprep.subr.bf16.mxu0 %v2535_v0  ;;  %2121 = vmatprep.subr.bf16.mxu1 %v2535_v0  ;;  %v2188_v27 = vpack.c.bf16 %v1220_v20, %v1219_v19  ;;  %v2285_v11 = vld [vmem:[#allocation7] sm:$0xff]  ;;  %v1230_v19 = vld [vmem:[#allocation13 + $0x158] sm:$0xff] }
 0x240   :  { %v1274_v20 = vld [vmem:[#allocation13 + $0x2b8] sm:$0xff] }
 0x242   :  { %2138 = vmatpush1.bf16.msra.mxu0 %v2137_v26  ;;  %2123 = vmatpush3.bf16.msra.mxu1 %v2122_v28  ;;  %v1200_v26 = vld [vmem:[#allocation13 + $0x68] sm:$0xff]  ;;  %v2178_v28 = vpack.c.bf16 %v1216_v21, %v1215_v17  ;;  %v2206_v17 = vpack.c.bf16 %v1246_v10, %v1245_v9  ;;  %v1247_v21 = vld [vmem:[#allocation13 + $0x1e0] sm:$0xff] }
 0x243   :  { %2139 = vmatprep.subr.bf16.mxu0 %v2535_v0  ;;  %2155 = vmatprep.subr.bf16.mxu1 %v2154_v30  ;;  %v1221_v30 = vld [vmem:[#allocation13 + $0x110] sm:$0xff]  ;;  %v2180_v36 = vpack.c.bf16 %v1200_v26, %v1199_v25  ;;  %v1258_v26 = vld [vmem:[#allocation13 + $0x238] sm:$0xff] }
 0x244   :  { %v1257_v25 = vld [vmem:[#allocation13 + $0x230] sm:$0xff] }
 0x245   :  { %1838 = vmatmul.mubr.msk.f32.vlgmr.msra.gmra.mrb[6].mxu1 %vm183_vm2, %v2281_v44  ;;  %v1224_v44 = vld [vmem:[#allocation13 + $0x128] sm:$0xff] }
 0x246   :  { %2141 = vmatpush1.bf16.msra.mxu0 %v2140_v35  ;;  %2157 = vmatpush3.bf16.msra.mxu1 %v2156_v37  ;;  %v2283_v35 = vld [vmem:[#allocation5] sm:$0xff]  ;;  %v1201_v37 = vld [vmem:[#allocation13 + $0x70] sm:$0xff]  ;;  %v2196_v52 = vpack.c.bf16 %v1224_v44, %v1223_v43 }
 0x247   :  { %2142 = vmatprep.subr.bf16.mxu0 %v2535_v0  ;;  %2159 = vmatprep.subr.bf16.mxu1 %v2158_v39  ;;  %v2192_v39 = vpack.c.bf16 %v1222_v31, %v1221_v30  ;;  %v1231_v30 = vld [vmem:[#allocation13 + $0x160] sm:$0xff]  ;;  %v1232_v31 = vld [vmem:[#allocation13 + $0x168] sm:$0xff]  ;;  %v1277_v43 = vld [vmem:[#allocation13 + $0x2d0] sm:$0xff] }
 0x248   :  { %1354 = vmatprep.mubr.f32.mxu1 %v2282_v54  ;;  %v1269_v54 = vld [vmem:[#allocation13 + $0x290] sm:$0xff]  ;;  %v1278_v44 = vld [vmem:[#allocation13 + $0x2d8] sm:$0xff] }
 0x249   :  { %v2222_v3 = vpack.c.bf16 %v1270_v58, %v1269_v54  ;;  %v1263_v54 = vld [vmem:[#allocation13 + $0x260] sm:$0xff] }
 0x24a   :  { %2144 = vmatpush1.bf16.msra.mxu0 %v2143_v45  ;;  %2161 = vmatpush3.bf16.msra.mxu1 %v2160_v47  ;;  %v1268_v45 = vld [vmem:[#allocation13 + $0x288] sm:$0xff]  ;;  %v1242_v47 = vld [vmem:[#allocation13 + $0x1b8] sm:$0xff] }
 0x24b   :  { %2145 = vmatprep.subr.bf16.mxu0 %v2535_v0  ;;  %2163 = vmatprep.subr.bf16.mxu1 %v2162_v49  ;;  %v2184_v49 = vpack.c.bf16 %v1202_v38, %v1201_v37  ;;  %v2218_v53 = vpack.c.bf16 %v1268_v45, %v1267_v41  ;;  %v2212_v37 = vpack.c.bf16 %v1232_v31, %v1231_v30  ;;  %v1233_v41 = vld [vmem:[#allocation13 + $0x170] sm:$0xff]  ;;  %v2287_v58 = vld [vmem:[#allocation7 + $0x10] sm:$0xff] }
 0x24c   :  { %v2234_v38 = vpack.c.bf16 %v1276_v32, %v1275_v29 }
 0x24e   :  { %2147 = vmatpush1.bf16.msra.mxu0 %v2146_v55  ;;  %2165 = vmatpush3.bf16.msra.mxu1 %v2164_v57  ;;  %v2198_v55 = vpack.c.bf16 %v1242_v47, %v1241_v46  ;;  %v1226_v57 = vld [vmem:[#allocation13 + $0x138] sm:$0xff]  ;;  %v2238_v47 = vpack.c.bf16 %v1278_v44, %v1277_v43 }
 0x24f   :  { %2148 = vmatprep.subr.bf16.mxu0 %v2535_v0  ;;  %2167 = vmatprep.subr.bf16.mxu1 %v2166_v59  ;;  %v1243_v59 = vld [vmem:[#allocation13 + $0x1c0] sm:$0xff] }
 0x252   :  { %2150 = vmatpush1.bf16.msra.mxu0 %v2149_v2  ;;  %2169 = vmatpush3.bf16.msra.mxu1 %v2168_v5  ;;  %v2200_v2 = vpack.c.bf16 %v1226_v57, %v1225_v56  ;;  %v2202_v5 = vpack.c.bf16 %v1244_v60, %v1243_v59  ;;  %v1281_v56 = vld [vmem:[#allocation13 + $0x2f0] sm:$0xff]  ;;  %v1282_v57 = vld [vmem:[#allocation13 + $0x2f8] sm:$0xff] }
 0x253   :  { %2151 = vmatprep.subr.bf16.mxu0 %v2535_v0  ;;  %2171 = vmatprep.subr.bf16.mxu1 %v2170_v6  ;;  %v2190_v0 = vpack.c.bf16 %v1238_v23, %v1237_v22  ;;  %v1227_v6 = vld [vmem:[#allocation13 + $0x140] sm:$0xff]  ;;  %v1248_v22 = vld [vmem:[#allocation13 + $0x1e8] sm:$0xff]  ;;  %v2286_v23 = vld [vmem:[#allocation7 + $0x28] sm:$0xff]  ;;  %v2246_v60 = vpack.c.bf16 %v1282_v57, %v1281_v56 }
 0x254   :  { %v2204_v15 = vpack.c.bf16 %v1228_v7, %v1227_v6  ;;  %v823_v7 = vld [vmem:[%s3297_s16] sm:$0xf] }
 0x256   :  { %2153 = vmatpush1.bf16.msra.mxu0 %v2152_v13  ;;  %2173 = vmatpush3.bf16.msra.mxu1 %v2172_v14  ;;  %v1255_v13 = vld [vmem:[#allocation13 + $0x220] sm:$0xff]  ;;  %v1256_v14 = vld [vmem:[#allocation13 + $0x228] sm:$0xff] }
 0x257   :  { %2175 = vmatprep.subr.bf16.mxu1 %v2174_v1  ;;  %2187 = vmatprep.subr.bf16.mxu0 %v2186_v18  ;;  %v1273_v1 = vld [vmem:[#allocation13 + $0x2b0] sm:$0xff] }
 0x258   :  { %v1229_v18 = vld [vmem:[#allocation13 + $0x150] sm:$0xff] }
 0x259   :  { %1176 = vmatmul.mubr.f32.vlgmr.msra.gmra.mrb[8].mxu0 %v2283_v35  ;;  %v2232_v35 = vpack.c.bf16 %v1258_v26, %v1257_v25 }
 0x25a   :  { %2177 = vmatpush3.bf16.msra.mxu1 %v2176_v24  ;;  %2189 = vmatpush3.bf16.msra.mxu0 %v2188_v27  ;;  %v2228_v24 = vpack.c.bf16 %v1256_v14, %v1255_v13  ;;  %v2208_v27 = vpack.c.bf16 %v1230_v19, %v1229_v18 }
 0x25b   :  { %2179 = vmatprep.subr.bf16.mxu1 %v2178_v28  ;;  %2191 = vmatprep.subr.bf16.mxu0 %v2190_v0  ;;  %v2230_v28 = vpack.c.bf16 %v1274_v20, %v1273_v1  ;;  %v2210_v0 = vpack.c.bf16 %v1248_v22, %v1247_v21 }
 0x25c   :  { %1424 = vmatprep.mubr.f32.mxu0 %v2284_v48  ;;  %v1261_v48 = vld [vmem:[#allocation13 + $0x250] sm:$0xff] }
 0x25e   :  { %2181 = vmatpush3.bf16.msra.mxu1 %v2180_v36  ;;  %2193 = vmatpush3.bf16.msra.mxu0 %v2192_v39  ;;  %v1259_v36 = vld [vmem:[#allocation13 + $0x240] sm:$0xff]  ;;  %v1260_v39 = vld [vmem:[#allocation13 + $0x248] sm:$0xff] }
 0x25f   :  { %2183 = vmatprep.subr.bf16.mxu1 %v2182_v40  ;;  %2195 = vmatprep.subr.bf16.mxu0 %v2194_v42  ;;  %v2214_v40 = vpack.c.bf16 %v1250_v34, %v1249_v33  ;;  %v1234_v42 = vld [vmem:[#allocation13 + $0x178] sm:$0xff]  ;;  %v2236_v45 = vpack.c.bf16 %v1260_v39, %v1259_v36 }
 0x260   :  { %v2216_v46 = vpack.c.bf16 %v1234_v42, %v1233_v41 }
 0x262   :  { %2185 = vmatpush3.bf16.msra.mxu1 %v2184_v49  ;;  %2197 = vmatpush3.bf16.msra.mxu0 %v2196_v52  ;;  %v1262_v49 = vld [vmem:[#allocation13 + $0x258] sm:$0xff] }
 0x263   :  { %2219 = vmatprep.subr.bf16.mxu1 %v2218_v53  ;;  %2199 = vmatprep.subr.bf16.mxu0 %v2198_v55  ;;  %v2240_v52 = vpack.c.bf16 %v1262_v49, %v1261_v48  ;;  %v2242_v53 = vpack.c.bf16 %v1280_v51, %v1279_v50  ;;  %v1264_v55 = vld [vmem:[#allocation13 + $0x268] sm:$0xff] }
 0x264   :  { %v2244_v59 = vpack.c.bf16 %v1264_v55, %v1263_v54 }
 0x265   :  { %1355 = vmatmul.mubr.f32.vlgmr.msra.gmra.mrb[8].mxu1 %v2285_v11 }
 0x266   :  { %2221 = vmatpush3.bf16.msra.mxu1 %v2220_v61  ;;  %2201 = vmatpush3.bf16.msra.mxu0 %v2200_v2  ;;  %v1265_v61 = vld [vmem:[#allocation13 + $0x270] sm:$0xff] }
 0x267   :  { %2223 = vmatprep.subr.bf16.mxu1 %v2222_v3  ;;  %2203 = vmatprep.subr.bf16.mxu0 %v2202_v5  ;;  %v2248_v63 = vpack.c.bf16 %v1266_v62, %v1265_v61  ;;  %v2288_v2 = vld [vmem:[#allocation7 + $0x20] sm:$0xff]  ;;  %v825_v3 = vlaneseq }
 0x268   :  { %1494 = vmatprep.mubr.f32.mxu1 %v2286_v23  ;;  %v1557_v23 = vld [vmem:[%s3293_s12] ss:$0 sm:$0xff] }
 0x269   :  { %v826_v4 = vshrl.u32 %v825_v3, 7 }
 0x26a   :  { %2225 = vmatpush3.bf16.msra.mxu1 %v2224_v12  ;;  %2205 = vmatpush3.bf16.msra.mxu0 %v2204_v15 }
 0x26b   :  { %2227 = vmatprep.subr.bf16.mxu1 %v2226_v16  ;;  %2207 = vmatprep.subr.bf16.mxu0 %v2206_v17  ;;  %v827_v5 = vsub.s32 0, %v826_v4  ;;  %v835_v6 = vsub.s32 2, %v826_v4  ;;  %v831_v8 = vsub.s32 1, %v826_v4  ;;  %v839_v9 = vsub.s32 3, %v826_v4 }
 0x26d   :  { %v828_v10 = vrot.slane %v823_v7, %v827_v5  ;;  %v836_v11 = vrot.slane %v823_v7, %v835_v6  ;;  %v832_v12 = vrot.slane %v823_v7, %v831_v8  ;;  %v840_v13 = vrot.slane %v823_v7, %v839_v9 }
 0x26e   :  { %2229 = vmatpush3.bf16.msra.mxu1 %v2228_v24  ;;  %2209 = vmatpush3.bf16.msra.mxu0 %v2208_v27 }
 0x26f   :  { %2231 = vmatprep.subr.bf16.mxu1 %v2230_v28  ;;  %2211 = vmatprep.subr.bf16.mxu0 %v2210_v0 }
 0x272   :  { %2233 = vmatpush3.bf16.msra.mxu1 %v2232_v35  ;;  %2213 = vmatpush3.bf16.msra.mxu0 %v2212_v37 }
 0x273   :  { %2235 = vmatprep.subr.bf16.mxu1 %v2234_v38  ;;  %2215 = vmatprep.subr.bf16.mxu0 %v2214_v40 }
 0x276   :  { %2237 = vmatpush3.bf16.msra.mxu1 %v2236_v45  ;;  %2217 = vmatpush3.bf16.msra.mxu0 %v2216_v46 }
 0x277   :  { %2239 = vmatprep.subr.bf16.mxu1 %v2238_v47 }
 0x279   :  { %1425 = vmatmul.mubr.f32.vlgmr.msra.gmra.mrb[10].mxu0 %v2287_v58 }
 0x27a   :  { %2241 = vmatpush3.bf16.msra.mxu1 %v2240_v52 }
 0x27b   :  { %2243 = vmatprep.subr.bf16.mxu1 %v2242_v53 }
 0x27e   :  { %2245 = vmatpush3.bf16.msra.mxu1 %v2244_v59 }
 0x27f   :  { %2247 = vmatprep.subr.bf16.mxu1 %v2246_v60 }
 0x282   :  { %2249 = vmatpush3.bf16.msra.mxu1 %v2248_v63 }
 0x285   :  { %1495 = vmatmul.mubr.f32.vlgmr.msra.gmra.mrb[10].mxu1 %v2288_v2 }
 0x304   :  { %v911_v14 = vpop.f32.mrb[4].mxu1  ;;  %v982_v15 = vpop.f32.mrb[6].mxu0 }
 0x305   :  { %v912_v16 = vadd.f32 %v911_v14, %v828_v10  ;;  %v983_v1 = vadd.f32 %v982_v15, %v836_v11  ;;  %v913_v17 = vpop.f32.mrb[5].mxu1  ;;  %v984_v18 = vpop.f32.mrb[7].mxu0 }
 0x306   :  { %v914_v19 = vadd.f32 %v913_v17, %v832_v12  ;;  %v985_v20 = vadd.f32 %v984_v18, %v840_v13 }
 0x307   :  { %987 = vst [vmem:[#allocation17] sm:$0xff] %v912_v16  ;;  %989 = vst [vmem:[#allocation17 + $0x10] sm:$0xff] %v983_v1 }
 0x308   :  { %988 = vst [vmem:[#allocation17 + $0x8] sm:$0xff] %v914_v19  ;;  %990 = vst [vmem:[#allocation17 + $0x18] sm:$0xff] %v985_v20 }
 0x318   :  { %v1074_v21 = vpop.f32.mrb[6].mxu1 }
 0x319   :  { %v1839_v22 = vpop.f32.mrb[7].mxu1 }
 0x32c   :  { %v1177_v24 = vpop.f32.mrb[8].mxu0 }
 0x32d   :  { %v1178_v25 = vadd.f32 %v1557_v23, %v1177_v24  ;;  %v1179_v26 = vpop.f32.mrb[9].mxu0 }
 0x32f   :  { %v1182_v27 = vmin.f32 %v1178_v25, 0.0 }
 0x331   :  { %v1183_v28 = vmul.f32 1.442695, %v1182_v27 }
 0x333   :  { %2274 = vpow2.f32 %v1183_v28 }
 0x334   :  { %2476 = shalt.err (!%p2473_p12)
}
 0x335   :  { %s2477_s12 = scalar_lea.hbm %s3299_s18, 512 }
 0x336   :  { %p2478_p13 = scmp.ne.s32.totalorder %s3299_s18, %s2477_s12  ;;  %p2481_p0 = scmp.lt.u32.totalorder %s2477_s12, %s3299_s18 }
 0x338   :  { %p2483_p1 = pnand %p2481_p0, %p2478_p13 }
 0x33a   :  { %2486 = shalt.err (!%p2483_p1)
}
 0x33b   :  { %1532 = dma.vmem_to_hbm [thread:$0]  %s1530_s3, 512, %s3299_s18, [#allocation18]   ;;  %v1721_v29 = vpop.f32.mrb[8].mxu1  ;;  %vm1181_vm7 = vcmp.gt.f32.partialorder %v1178_v25, 0.0  ;;  %v1560_v34 = vld [vmem:[%s3295_s14] ss:$0 sm:$0xff] }
 0x33c   :  { %v1722_v0 = vpop.f32.mrb[9].mxu1  ;;  %v1554_v49 = vld [vmem:[#allocation11] ss:$0 sm:$0xff]  ;;  %s2540_s14 = smov [#allocation16]  }
 0x33d   :  { %v1723_v30 = vadd.f32 %v1722_v0, %v1721_v29  ;;  %v2275_v31 = vpop.eup %2274  ;;  %v1075_v50 = vadd.f32 %v1554_v49, %v1074_v21  ;;  %s1519_s18 = sshll.u32 %s2540_s14, 4  ;;  %s1520_s18 = int_to_ptr.vmem [resolvable:$true] %s1519_s18 }
 0x33e   :  { %v1559_v32 = vadd.f32 -1.0, %v2275_v31  ;;  %p2492_p3 = scmp.lt.s32.totalorder %s1520_s18, %s1520_s18 }
 0x33f   :  { %v1357_v35 = vadd.f32 %v1723_v30, %v1560_v34  ;;  %v1079_v51 = vmin.f32 %v1075_v50, 0.0  ;;  %vm1078_vm9 = vcmp.gt.f32.partialorder %v1075_v50, 0.0 }
 0x340   :  { %v1186_v33 = vsel %vm1181_vm7, %v1178_v25, %v1559_v32 }
 0x341   :  { %1507 = vrot.lane.b32.xlu0 %v1186_v33, %s2538_s7  ;;  %v1080_v52 = vmul.f32 1.442695, %v1079_v51  ;;  %s2487_s7 = scalar_lea.vmem %s1520_s18, 256 }
 0x342   :  { %p2488_p2 = scmp.ne.s32.totalorder %s1520_s18, %s2487_s7  ;;  %p2493_p4 = scmp.lt.s32.totalorder %s2487_s7, %s2487_s7 }
 0x344   :  { %p2494_p5 = por %p2493_p4, %p2492_p3 }
 0x346   :  { %p2495_p6 = pnand %p2494_p5, %p2488_p2 }
 0x34c   :  { %v1756_v36 = vpop.f32.mrb[10].mxu0 }
 0x34d   :  { %v1757_v37 = vpop.f32.mrb[11].mxu0 }
 0x34e   :  { %v1758_v38 = vadd.f32 %v1757_v37, %v1756_v36 }
 0x350   :  { %v1427_v39 = vadd.f32 %v1758_v38, %v1357_v35 }
 0x358   :  { %v1791_v40 = vpop.f32.mrb[10].mxu1 }
 0x359   :  { %v1792_v41 = vpop.f32.mrb[11].mxu1 }
 0x35a   :  { %v1793_v42 = vadd.f32 %v1792_v41, %v1791_v40 }
 0x35c   :  { %v1497_v43 = vadd.f32 %v1793_v42, %v1427_v39 }
 0x35e   :  { %v1501_v44 = vmin.f32 %v1497_v43, 0.0  ;;  %vm1500_vm8 = vcmp.gt.f32.partialorder %v1497_v43, 0.0 }
 0x360   :  { %v1502_v45 = vmul.f32 1.442695, %v1501_v44 }
 0x362   :  { %2276 = vpow2.f32 %v1502_v45 }
 0x363   :  { %2278 = vpow2.f32 %v1080_v52 }
 0x36c   :  { %v2277_v46 = vpop.eup %2276 }
 0x36d   :  { %v1561_v47 = vadd.f32 -1.0, %v2277_v46  ;;  %v2279_v53 = vpop.eup %2278 }
 0x36e   :  { %v1556_v54 = vadd.f32 -1.0, %v2279_v53 }
 0x36f   :  { %v1505_v48 = vsel %vm1500_vm8, %v1497_v43, %v1561_v47 }
 0x370   :  { %1512 = vst [vmem:[#allocation16 + $0x8] sm:$0xff] %v1505_v48  ;;  %v1083_v56 = vsel %vm1078_vm9, %v1075_v50, %v1556_v54 }
 0x3b3   :  { %v1508_v55 = vpop.permute.xlu0 %1507 }
 0x3b4   :  { %v1510_v57 = vsel %vm693_vm6, %v1083_v56, %v1508_v55 }
 0x3b5   :  { %1511 = vst [vmem:[#allocation16] sm:$0xff] %v1510_v57 }
 0x3b6   :  { %2498 = shalt.err (!%p2495_p6)
}
 0x3b7   :  { %s2499_s4 = scalar_lea.hbm %s3298_s17, 256 }
 0x3b8   :  { %p2500_p7 = scmp.ne.s32.totalorder %s3298_s17, %s2499_s4  ;;  %p2503_p8 = scmp.lt.u32.totalorder %s2499_s4, %s3298_s17 }
 0x3ba   :  { %p2505_p9 = pnand %p2503_p8, %p2500_p7 }
 0x3bc   :  { %2508 = shalt.err (!%p2505_p9)
}
 0x3bd   :  { %1522 = dma.vmem_to_hbm [thread:$0]  %s1520_s18, 256, %s3298_s17, [#allocation4]  }
 0x3be   :  { %2519 = dma.done.wait [#allocation4], 256  }
 0x3bf   :  { %2520 = vsyncadd [#allocation4], 4294967040 }
 0x3c0   :  { %2521 = dma.done.wait [#allocation18], 512  }
 0x3c1   :  { %2522 = vsyncadd [#allocation18], 4294966784 }
 0x3c2   :  { %1539 = vsyncpa [#allocation3], 1 }
 0x3c3   :  { %1540 = vsyncpa [#allocation6], 1 }
 0x3c4   :  { %1541 = vsyncpa [#allocation9], 1 }
 0x3c5   :  { %1542 = vsyncpa [#allocation12], 1 }
 0x3c6   :  { %1543 = vsyncpa [#allocation15], 1 }
 0x3c7   :  { %1544 = vsyncpa [#allocation4], 1 }
 0x3c8   :  { %1545 = vsyncpa [#allocation18], 1 }

</bundles_post_ra>
